<compile_context>
chip_gen: v6e
topology: v6e:2x2x1
jax: 0.10.0
libtpu: 0.0.40
codegen_flags: <defaults>
</compile_context>

<pallas_src>
import functools

import jax
import jax.numpy as jnp
from jax.experimental import pallas as pl
from jax.experimental.pallas import tpu as pltpu

# ---- model config (matches the nn.Module __init__ shapes, small for demo) ----
INPUT_DIM = 16
HIDDEN = 32
NUM_LAYERS = 2
BATCH = 16
LANES = 128            # every feature axis is zero-padded to the 128-lane width
VEC_ROWS = 8           # each bias / LN row gets an 8-row (sublane-aligned) slot


# ----------------------------- math helpers ----------------------------------
_SQRT_2_OVER_PI = 0.7978845608028654


def _gelu(x):
    # tanh-approximate GELU: the tanh goes to the EUP slot (free w.r.t. the VALU).
    # TODO(synk): torch.nn.GELU() default is exact-erf GELU; the tanh approximation
    # deviates by ~1e-3 abs per activation (checked loosely against erf below).
    return 0.5 * x * (1.0 + jnp.tanh(_SQRT_2_OVER_PI * (x + 0.044715 * x * x * x)))


def _layer_norm_padded(x, g, b, mask, d, eps=1e-5):
    # x is (B, 128) with exact zeros in the padded columns; g/b are zero-padded, so
    # the LN output keeps exact zeros in the padded columns as well.
    inv_d = 1.0 / d
    mu = jnp.sum(x, axis=-1, keepdims=True) * inv_d        # padded cols are zero
    xc = (x - mu) * mask                                   # mask out padded cols
    var = jnp.sum(xc * xc, axis=-1, keepdims=True) * inv_d
    return xc * jax.lax.rsqrt(var + eps) * g + b


def _mm(a, w):
    return jnp.dot(a, w, preferred_element_type=jnp.float32)


# ------------------------------- Pallas kernel --------------------------------
def filternet_kernel(offsets, num_layers, hidden, x_ref, slab_ref, o_ref):
    def w(name):                      # (128, 128) zero-padded weight block
        r, n = offsets[name]
        return slab_ref[r:r + n, :]

    def v(name):                      # (1, 128) zero-padded bias / LN row
        r, _ = offsets[name]
        return slab_ref[r:r + 1, :]

    lanes = o_ref.shape[-1]
    col = jax.lax.broadcasted_iota(jnp.int32, (1, lanes), 1)
    mask_h = (col < hidden).astype(jnp.float32)
    mask_h2 = (col < hidden // 2).astype(jnp.float32)

    x = x_ref[...]                    # (TB, 128), zero beyond input_dim

    # embedding: Linear -> GELU -> LayerNorm -> Dropout(identity)
    h = _layer_norm_padded(_gelu(_mm(x, w("emb_w")) + v("emb_b")),
                           v("emb_g"), v("emb_beta"), mask_h, hidden)
    identity = h

    # interaction blocks: (Lin -> GELU -> Lin) + residual Lin, LayerNorm
    for i in range(num_layers):
        out = _mm(_gelu(_mm(h, w(f"l{i}_w1")) + v(f"l{i}_b1")), w(f"l{i}_w2")) + v(f"l{i}_b2")
        res = _mm(identity, w(f"l{i}_wr")) + v(f"l{i}_br")
        h = _layer_norm_padded(out + res, v(f"l{i}_g"), v(f"l{i}_beta"), mask_h, hidden)
        identity = h

    # attention heads: Softmax(dim=1) over a size-1 axis is identically 1, so both
    # attended outputs equal h; their output-head weight slices were pre-summed on
    # the host into "o1_attn" (constant fold, zero numerical change).
    # TODO(synk): this mirrors the literal PyTorch module (softmax over the size-1
    # dim of a (B, 1) tensor); confirm the intended softmax axis before relying on it.

    # pyramid projections (all applied to h)
    pyr = [_mm(h, w(f"p{i}_w")) + v(f"p{i}_b") for i in range(3)]

    # output head; the feature concat is folded into per-feature partial matmuls
    acc = _mm(h, w("o1_attn"))
    for i in range(3):
        acc = acc + _mm(pyr[i], w(f"o1_p{i}"))
    o = _layer_norm_padded(_gelu(acc + v("o1_b")), v("o1_g"), v("o1_beta"), mask_h, hidden)
    o = _layer_norm_padded(_gelu(_mm(o, w("o2_w")) + v("o2_b")),
                           v("o2_g"), v("o2_beta"), mask_h2, hidden // 2)
    # lane-dense (TB, 128) store; column 0 holds the scalar output, rest are zeros
    o_ref[...] = _mm(o, w("o3_w")) + v("o3_b")


# --------------------------- raw (torch-like) params ---------------------------
def init_raw_params(key, input_dim, hidden, num_layers):
    """kaiming_normal_(nonlinearity='relu') weights, zero biases, unit LayerNorm."""
    kit = iter(jax.random.split(key, 64))

    def linear(din, dout):
        std = (2.0 / din) ** 0.5
        return {"w": jax.random.normal(next(kit), (din, dout), jnp.float32) * std,
                "b": jnp.zeros((dout,), jnp.float32)}

    def lnorm(d):
        return {"g": jnp.ones((d,), jnp.float32), "b": jnp.zeros((d,), jnp.float32)}

    p = {"emb": linear(input_dim, hidden), "emb_ln": lnorm(hidden), "layers": []}
    for _ in range(num_layers):
        p["layers"].append({"w1": linear(hidden, 2 * hidden),
                            "w2": linear(2 * hidden, hidden),
                            "res": linear(hidden, hidden),
                            "ln": lnorm(hidden)})
    p["attn"] = [{"a1": linear(hidden, hidden // 2), "a2": linear(hidden // 2, 1)}
                 for _ in range(2)]
    p["pyr"] = [linear(hidden, hidden // (2 ** i)) for i in range(3)]
    cat_dim = 2 * hidden + hidden + hidden // 2 + hidden // 4
    p["out1"] = linear(cat_dim, hidden)
    p["out1_ln"] = lnorm(hidden)
    p["out2"] = linear(hidden, hidden // 2)
    p["out2_ln"] = lnorm(hidden // 2)
    p["out3"] = linear(hidden // 2, 1)
    return p


# ------------------------------ parameter packing -------------------------------
def pack_params(p, hidden, num_layers, lanes=LANES):
    """Pack every parameter into one zero-padded (rows, lanes) f32 slab.

    Weights become (lanes, lanes) blocks (rows = contraction dim, zero-padded),
    biases / LN rows become (VEC_ROWS, lanes) blocks with the data in row 0.
    All row offsets are multiples of 8, so in-kernel slices never cross a
    (8, 128) tile boundary.
    """
    blocks = []

    def add_w(name, w2d):
        buf = jnp.zeros((lanes, lanes), jnp.float32)
        buf = buf.at[:w2d.shape[0], :w2d.shape[1]].set(w2d)
        blocks.append((name, buf))

    def add_v(name, vec):
        buf = jnp.zeros((VEC_ROWS, lanes), jnp.float32)
        buf = buf.at[0, :vec.shape[0]].set(vec)
        blocks.append((name, buf))

    add_w("emb_w", p["emb"]["w"]); add_v("emb_b", p["emb"]["b"])
    add_v("emb_g", p["emb_ln"]["g"]); add_v("emb_beta", p["emb_ln"]["b"])
    for i, lyr in enumerate(p["layers"]):
        add_w(f"l{i}_w1", lyr["w1"]["w"]); add_v(f"l{i}_b1", lyr["w1"]["b"])
        add_w(f"l{i}_w2", lyr["w2"]["w"]); add_v(f"l{i}_b2", lyr["w2"]["b"])
        add_w(f"l{i}_wr", lyr["res"]["w"]); add_v(f"l{i}_br", lyr["res"]["b"])
        add_v(f"l{i}_g", lyr["ln"]["g"]); add_v(f"l{i}_beta", lyr["ln"]["b"])
    for i, pr in enumerate(p["pyr"]):
        add_w(f"p{i}_w", pr["w"]); add_v(f"p{i}_b", pr["b"])

    # Output-head Linear #1: split along its input dim so the kernel folds the
    # concat into partial matmuls; the two attention slices are pre-summed because
    # the attention re-weighting is exactly the identity (size-1 softmax == 1).
    wo1 = p["out1"]["w"]
    h = hidden
    add_w("o1_attn", wo1[0:h] + wo1[h:2 * h])
    off = 2 * h
    for i, d in enumerate((h, h // 2, h // 4)):
        add_w(f"o1_p{i}", wo1[off:off + d]); off += d
    add_v("o1_b", p["out1"]["b"])
    add_v("o1_g", p["out1_ln"]["g"]); add_v("o1_beta", p["out1_ln"]["b"])
    add_w("o2_w", p["out2"]["w"]); add_v("o2_b", p["out2"]["b"])
    add_v("o2_g", p["out2_ln"]["g"]); add_v("o2_beta", p["out2_ln"]["b"])
    add_w("o3_w", p["out3"]["w"]); add_v("o3_b", p["out3"]["b"])

    offsets, row = {}, 0
    for name, buf in blocks:
        offsets[name] = (row, buf.shape[0])
        row += buf.shape[0]
    slab = jnp.concatenate([b for _, b in blocks], axis=0)
    return slab, offsets


# ------------------------------- wrapper ---------------------------------------
def filternet_forward(x, slab, offsets, num_layers, hidden, *, batch_tile=None,
                      lanes=LANES):
    B, D = x.shape
    assert D <= lanes and 2 * hidden <= lanes and B % 8 == 0
    if batch_tile is None:
        # whole batch in one grid step for small/medium batches (per-step overhead)
        batch_tile = B if B <= 1024 else 1024
    assert B % batch_tile == 0 and batch_tile % 8 == 0

    # lane-dense input slab: features zero-padded to 128 lanes
    x_p = jnp.zeros((B, lanes), jnp.float32).at[:, :D].set(x)

    kernel = functools.partial(filternet_kernel, offsets, num_layers, hidden)
    out_p = pl.pallas_call(
        kernel,
        out_shape=jax.ShapeDtypeStruct((B, lanes), jnp.float32),
        grid_spec=pltpu.PrefetchScalarGridSpec(
            num_scalar_prefetch=0,
            grid=(B // batch_tile,),
            in_specs=[
                pl.BlockSpec((batch_tile, lanes), lambda i: (i, 0)),
                pl.BlockSpec(slab.shape, lambda i: (0, 0)),   # one resident slab
            ],
            out_specs=pl.BlockSpec((batch_tile, lanes), lambda i: (i, 0)),
        ),
        compiler_params=pltpu.CompilerParams(
            dimension_semantics=("parallel",)),
    )(x_p, slab)
    return out_p[:, :1]


# ------------------------- plain-JAX reference (literal module) -----------------
def reference_forward(x, p, num_layers, gelu_fn):
    hi = jax.lax.Precision.HIGHEST

    def lin(h, l):
        return jnp.dot(h, l["w"], precision=hi,
                       preferred_element_type=jnp.float32) + l["b"]

    def ln(h, l, eps=1e-5):
        mu = jnp.mean(h, -1, keepdims=True)
        var = jnp.mean((h - mu) ** 2, -1, keepdims=True)
        return (h - mu) * jax.lax.rsqrt(var + eps) * l["g"] + l["b"]

    h = ln(gelu_fn(lin(x, p["emb"])), p["emb_ln"])
    identity = h
    for lyr in p["layers"]:
        out = lin(gelu_fn(lin(h, lyr["w1"])), lyr["w2"])
        res = lin(identity, lyr["res"])
        h = ln(out + res, lyr["ln"])
        identity = h
    attn_outs = []
    for a in p["attn"]:
        wgt = lin(jnp.tanh(lin(h, a["a1"])), a["a2"])   # (B, 1)
        wgt = jax.nn.softmax(wgt, axis=1)               # size-1 axis -> exactly 1
        attn_outs.append(h * wgt)
    pyr_outs = [lin(h, q) for q in p["pyr"]]
    cat = jnp.concatenate(attn_outs + pyr_outs, axis=1)
    o = ln(gelu_fn(lin(cat, p["out1"])), p["out1_ln"])
    o = ln(gelu_fn(lin(o, p["out2"])), p["out2_ln"])
    return lin(o, p["out3"])


# --------------------------------- main -----------------------------------------
if __name__ == "__main__":
    key = jax.random.PRNGKey(0)
    kx, kp = jax.random.split(key)

    x = jax.random.normal(kx, (BATCH, INPUT_DIM), jnp.float32)
    raw = init_raw_params(kp, INPUT_DIM, HIDDEN, NUM_LAYERS)
    slab, offsets = pack_params(raw, HIDDEN, NUM_LAYERS)

    out = filternet_forward(x, slab, offsets, NUM_LAYERS, HIDDEN)
    out = jax.block_until_ready(out)
    assert out.shape == (BATCH, 1), out.shape

    # Structural check: identical tanh-GELU math through the literal (unpadded,
    # unfolded) module graph -> validates packing, padding, masking, folding.
    ref_tanh = reference_forward(x, raw, NUM_LAYERS, _gelu)
    assert jnp.allclose(out, ref_tanh, atol=5e-3, rtol=1e-3), \
        float(jnp.max(jnp.abs(out - ref_tanh)))

    # Fidelity check vs torch's exact-erf GELU (loose: covers the tanh-GELU delta).
    ref_erf = reference_forward(x, raw, NUM_LAYERS,
                                lambda v: jax.nn.gelu(v, approximate=False))
    assert jnp.allclose(out, ref_erf, atol=1e-1), \
        float(jnp.max(jnp.abs(out - ref_erf)))

    print("KERNEL_OK")
</pallas_src>

<mosaic_0001>
module attributes {stable_mosaic.version = 11 : i64} {
  func.func @filternet_kernel(%arg0: i32, %arg1: memref<16x128xf32, #tpu.memory_space<vmem>>, %arg2: memref<2232x128xf32, #tpu.memory_space<vmem>>, %arg3: memref<16x128xf32, #tpu.memory_space<vmem>>) attributes {dimension_semantics = [#tpu.dimension_semantics<parallel>], iteration_bounds = array<i64: 1>, scalar_prefetch = 0 : i64, scratch_operands = 0 : i64, tpu.core_type = #tpu.core_type<tc>, window_params = [{transform_indices = @transform_0, window_bounds = array<i64: 16, 128>}, {pipeline_mode = #tpu.pipeline_mode<synchronous>, transform_indices = @transform_1, window_bounds = array<i64: 2232, 128>}, {transform_indices = @transform_2, window_bounds = array<i64: 16, 128>}]} {
    %0 = tpu.iota {dimensions = array<i32: 1>} : vector<1x128xi32>
    %c32_i32 = arith.constant 32 : i32
    %1 = vector.broadcast %c32_i32 : i32 to vector<1x128xi32>
    %2 = arith.cmpi slt, %0, %1 : vector<1x128xi32>
    %3 = arith.extui %2 : vector<1x128xi1> to vector<1x128xi32>
    %4 = arith.sitofp %3 : vector<1x128xi32> to vector<1x128xf32>
    %c16_i32 = arith.constant 16 : i32
    %5 = vector.broadcast %c16_i32 : i32 to vector<1x128xi32>
    %6 = arith.cmpi slt, %0, %5 : vector<1x128xi32>
    %7 = arith.extui %6 : vector<1x128xi1> to vector<1x128xi32>
    %8 = arith.sitofp %7 : vector<1x128xi32> to vector<1x128xf32>
    %c0 = arith.constant 0 : index
    %c0_0 = arith.constant 0 : index
    %9 = vector.load %arg1[%c0, %c0_0] : memref<16x128xf32, #tpu.memory_space<vmem>>, vector<16x128xf32>
    %c0_1 = arith.constant 0 : index
    %c0_2 = arith.constant 0 : index
    %10 = vector.load %arg2[%c0_1, %c0_2] : memref<2232x128xf32, #tpu.memory_space<vmem>>, vector<128x128xf32>
    %cst = arith.constant dense<0.000000e+00> : vector<16x128xf32>
    %11 = tpu.matmul %9, %10, %cst {dimension_numbers = #tpu.dot_dimension_numbers<[1], [0], [0], [1], [0, 0, 1, 1], [], []>} : vector<16x128xf32>, vector<128x128xf32>, vector<16x128xf32> -> vector<16x128xf32>
    %c128 = arith.constant 128 : index
    %c0_3 = arith.constant 0 : index
    %12 = vector.load %arg2[%c128, %c0_3] : memref<2232x128xf32, #tpu.memory_space<vmem>>, vector<1x128xf32>
    %13 = vector.broadcast %12 : vector<1x128xf32> to vector<16x128xf32>
    %14 = arith.addf %11, %13 : vector<16x128xf32>
    %cst_4 = arith.constant 5.000000e-01 : f32
    %15 = vector.broadcast %cst_4 : f32 to vector<16x128xf32>
    %16 = arith.mulf %15, %14 : vector<16x128xf32>
    %cst_5 = arith.constant 4.471500e-02 : f32
    %17 = vector.broadcast %cst_5 : f32 to vector<16x128xf32>
    %18 = arith.mulf %17, %14 : vector<16x128xf32>
    %19 = arith.mulf %18, %14 : vector<16x128xf32>
    %20 = arith.mulf %19, %14 : vector<16x128xf32>
    %21 = arith.addf %14, %20 : vector<16x128xf32>
    %cst_6 = arith.constant 0.797884583 : f32
    %22 = vector.broadcast %cst_6 : f32 to vector<16x128xf32>
    %23 = arith.mulf %22, %21 : vector<16x128xf32>
    %24 = math.tanh %23 : vector<16x128xf32>
    %cst_7 = arith.constant 1.000000e+00 : f32
    %25 = vector.broadcast %cst_7 : f32 to vector<16x128xf32>
    %26 = arith.addf %25, %24 : vector<16x128xf32>
    %27 = arith.mulf %16, %26 : vector<16x128xf32>
    %c136 = arith.constant 136 : index
    %c0_8 = arith.constant 0 : index
    %28 = vector.load %arg2[%c136, %c0_8] : memref<2232x128xf32, #tpu.memory_space<vmem>>, vector<1x128xf32>
    %c144 = arith.constant 144 : index
    %c0_9 = arith.constant 0 : index
    %29 = vector.load %arg2[%c144, %c0_9] : memref<2232x128xf32, #tpu.memory_space<vmem>>, vector<1x128xf32>
    %cst_10 = arith.constant dense<0.000000e+00> : vector<16xf32>
    %30 = vector.multi_reduction <add>, %27, %cst_10 [1] : vector<16x128xf32> to vector<16xf32>
    %31 = vector.shape_cast %30 : vector<16xf32> to vector<16x1xf32>
    %cst_11 = arith.constant 3.125000e-02 : f32
    %32 = vector.broadcast %cst_11 : f32 to vector<16x1xf32>
    %33 = arith.mulf %31, %32 : vector<16x1xf32>
    %34 = vector.broadcast %33 : vector<16x1xf32> to vector<16x128xf32>
    %35 = arith.subf %27, %34 : vector<16x128xf32>
    %36 = vector.broadcast %4 : vector<1x128xf32> to vector<16x128xf32>
    %37 = arith.mulf %35, %36 : vector<16x128xf32>
    %38 = arith.mulf %37, %37 : vector<16x128xf32>
    %cst_12 = arith.constant dense<0.000000e+00> : vector<16xf32>
    %39 = vector.multi_reduction <add>, %38, %cst_12 [1] : vector<16x128xf32> to vector<16xf32>
    %40 = vector.shape_cast %39 : vector<16xf32> to vector<16x1xf32>
    %cst_13 = arith.constant 3.125000e-02 : f32
    %41 = vector.broadcast %cst_13 : f32 to vector<16x1xf32>
    %42 = arith.mulf %40, %41 : vector<16x1xf32>
    %cst_14 = arith.constant 9.99999974E-6 : f32
    %43 = vector.broadcast %cst_14 : f32 to vector<16x1xf32>
    %44 = arith.addf %42, %43 : vector<16x1xf32>
    %45 = math.rsqrt %44 : vector<16x1xf32>
    %46 = vector.broadcast %45 : vector<16x1xf32> to vector<16x128xf32>
    %47 = arith.mulf %37, %46 : vector<16x128xf32>
    %48 = vector.broadcast %28 : vector<1x128xf32> to vector<16x128xf32>
    %49 = arith.mulf %47, %48 : vector<16x128xf32>
    %50 = vector.broadcast %29 : vector<1x128xf32> to vector<16x128xf32>
    %51 = arith.addf %49, %50 : vector<16x128xf32>
    %c152 = arith.constant 152 : index
    %c0_15 = arith.constant 0 : index
    %52 = vector.load %arg2[%c152, %c0_15] : memref<2232x128xf32, #tpu.memory_space<vmem>>, vector<128x128xf32>
    %cst_16 = arith.constant dense<0.000000e+00> : vector<16x128xf32>
    %53 = tpu.matmul %51, %52, %cst_16 {dimension_numbers = #tpu.dot_dimension_numbers<[1], [0], [0], [1], [0, 0, 1, 1], [], []>} : vector<16x128xf32>, vector<128x128xf32>, vector<16x128xf32> -> vector<16x128xf32>
    %c280 = arith.constant 280 : index
    %c0_17 = arith.constant 0 : index
    %54 = vector.load %arg2[%c280, %c0_17] : memref<2232x128xf32, #tpu.memory_space<vmem>>, vector<1x128xf32>
    %55 = vector.broadcast %54 : vector<1x128xf32> to vector<16x128xf32>
    %56 = arith.addf %53, %55 : vector<16x128xf32>
    %cst_18 = arith.constant 5.000000e-01 : f32
    %57 = vector.broadcast %cst_18 : f32 to vector<16x128xf32>
    %58 = arith.mulf %57, %56 : vector<16x128xf32>
    %cst_19 = arith.constant 4.471500e-02 : f32
    %59 = vector.broadcast %cst_19 : f32 to vector<16x128xf32>
    %60 = arith.mulf %59, %56 : vector<16x128xf32>
    %61 = arith.mulf %60, %56 : vector<16x128xf32>
    %62 = arith.mulf %61, %56 : vector<16x128xf32>
    %63 = arith.addf %56, %62 : vector<16x128xf32>
    %cst_20 = arith.constant 0.797884583 : f32
    %64 = vector.broadcast %cst_20 : f32 to vector<16x128xf32>
    %65 = arith.mulf %64, %63 : vector<16x128xf32>
    %66 = math.tanh %65 : vector<16x128xf32>
    %cst_21 = arith.constant 1.000000e+00 : f32
    %67 = vector.broadcast %cst_21 : f32 to vector<16x128xf32>
    %68 = arith.addf %67, %66 : vector<16x128xf32>
    %69 = arith.mulf %58, %68 : vector<16x128xf32>
    %c288 = arith.constant 288 : index
    %c0_22 = arith.constant 0 : index
    %70 = vector.load %arg2[%c288, %c0_22] : memref<2232x128xf32, #tpu.memory_space<vmem>>, vector<128x128xf32>
    %cst_23 = arith.constant dense<0.000000e+00> : vector<16x128xf32>
    %71 = tpu.matmul %69, %70, %cst_23 {dimension_numbers = #tpu.dot_dimension_numbers<[1], [0], [0], [1], [0, 0, 1, 1], [], []>} : vector<16x128xf32>, vector<128x128xf32>, vector<16x128xf32> -> vector<16x128xf32>
    %c416 = arith.constant 416 : index
    %c0_24 = arith.constant 0 : index
    %72 = vector.load %arg2[%c416, %c0_24] : memref<2232x128xf32, #tpu.memory_space<vmem>>, vector<1x128xf32>
    %73 = vector.broadcast %72 : vector<1x128xf32> to vector<16x128xf32>
    %74 = arith.addf %71, %73 : vector<16x128xf32>
    %c424 = arith.constant 424 : index
    %c0_25 = arith.constant 0 : index
    %75 = vector.load %arg2[%c424, %c0_25] : memref<2232x128xf32, #tpu.memory_space<vmem>>, vector<128x128xf32>
    %cst_26 = arith.constant dense<0.000000e+00> : vector<16x128xf32>
    %76 = tpu.matmul %51, %75, %cst_26 {dimension_numbers = #tpu.dot_dimension_numbers<[1], [0], [0], [1], [0, 0, 1, 1], [], []>} : vector<16x128xf32>, vector<128x128xf32>, vector<16x128xf32> -> vector<16x128xf32>
    %c552 = arith.constant 552 : index
    %c0_27 = arith.constant 0 : index
    %77 = vector.load %arg2[%c552, %c0_27] : memref<2232x128xf32, #tpu.memory_space<vmem>>, vector<1x128xf32>
    %78 = vector.broadcast %77 : vector<1x128xf32> to vector<16x128xf32>
    %79 = arith.addf %76, %78 : vector<16x128xf32>
    %80 = arith.addf %74, %79 : vector<16x128xf32>
    %c560 = arith.constant 560 : index
    %c0_28 = arith.constant 0 : index
    %81 = vector.load %arg2[%c560, %c0_28] : memref<2232x128xf32, #tpu.memory_space<vmem>>, vector<1x128xf32>
    %c568 = arith.constant 568 : index
    %c0_29 = arith.constant 0 : index
    %82 = vector.load %arg2[%c568, %c0_29] : memref<2232x128xf32, #tpu.memory_space<vmem>>, vector<1x128xf32>
    %cst_30 = arith.constant dense<0.000000e+00> : vector<16xf32>
    %83 = vector.multi_reduction <add>, %80, %cst_30 [1] : vector<16x128xf32> to vector<16xf32>
    %84 = vector.shape_cast %83 : vector<16xf32> to vector<16x1xf32>
    %cst_31 = arith.constant 3.125000e-02 : f32
    %85 = vector.broadcast %cst_31 : f32 to vector<16x1xf32>
    %86 = arith.mulf %84, %85 : vector<16x1xf32>
    %87 = vector.broadcast %86 : vector<16x1xf32> to vector<16x128xf32>
    %88 = arith.subf %80, %87 : vector<16x128xf32>
    %89 = vector.broadcast %4 : vector<1x128xf32> to vector<16x128xf32>
    %90 = arith.mulf %88, %89 : vector<16x128xf32>
    %91 = arith.mulf %90, %90 : vector<16x128xf32>
    %cst_32 = arith.constant dense<0.000000e+00> : vector<16xf32>
    %92 = vector.multi_reduction <add>, %91, %cst_32 [1] : vector<16x128xf32> to vector<16xf32>
    %93 = vector.shape_cast %92 : vector<16xf32> to vector<16x1xf32>
    %cst_33 = arith.constant 3.125000e-02 : f32
    %94 = vector.broadcast %cst_33 : f32 to vector<16x1xf32>
    %95 = arith.mulf %93, %94 : vector<16x1xf32>
    %cst_34 = arith.constant 9.99999974E-6 : f32
    %96 = vector.broadcast %cst_34 : f32 to vector<16x1xf32>
    %97 = arith.addf %95, %96 : vector<16x1xf32>
    %98 = math.rsqrt %97 : vector<16x1xf32>
    %99 = vector.broadcast %98 : vector<16x1xf32> to vector<16x128xf32>
    %100 = arith.mulf %90, %99 : vector<16x128xf32>
    %101 = vector.broadcast %81 : vector<1x128xf32> to vector<16x128xf32>
    %102 = arith.mulf %100, %101 : vector<16x128xf32>
    %103 = vector.broadcast %82 : vector<1x128xf32> to vector<16x128xf32>
    %104 = arith.addf %102, %103 : vector<16x128xf32>
    %c576 = arith.constant 576 : index
    %c0_35 = arith.constant 0 : index
    %105 = vector.load %arg2[%c576, %c0_35] : memref<2232x128xf32, #tpu.memory_space<vmem>>, vector<128x128xf32>
    %cst_36 = arith.constant dense<0.000000e+00> : vector<16x128xf32>
    %106 = tpu.matmul %104, %105, %cst_36 {dimension_numbers = #tpu.dot_dimension_numbers<[1], [0], [0], [1], [0, 0, 1, 1], [], []>} : vector<16x128xf32>, vector<128x128xf32>, vector<16x128xf32> -> vector<16x128xf32>
    %c704 = arith.constant 704 : index
    %c0_37 = arith.constant 0 : index
    %107 = vector.load %arg2[%c704, %c0_37] : memref<2232x128xf32, #tpu.memory_space<vmem>>, vector<1x128xf32>
    %108 = vector.broadcast %107 : vector<1x128xf32> to vector<16x128xf32>
    %109 = arith.addf %106, %108 : vector<16x128xf32>
    %cst_38 = arith.constant 5.000000e-01 : f32
    %110 = vector.broadcast %cst_38 : f32 to vector<16x128xf32>
    %111 = arith.mulf %110, %109 : vector<16x128xf32>
    %cst_39 = arith.constant 4.471500e-02 : f32
    %112 = vector.broadcast %cst_39 : f32 to vector<16x128xf32>
    %113 = arith.mulf %112, %109 : vector<16x128xf32>
    %114 = arith.mulf %113, %109 : vector<16x128xf32>
    %115 = arith.mulf %114, %109 : vector<16x128xf32>
    %116 = arith.addf %109, %115 : vector<16x128xf32>
    %cst_40 = arith.constant 0.797884583 : f32
    %117 = vector.broadcast %cst_40 : f32 to vector<16x128xf32>
    %118 = arith.mulf %117, %116 : vector<16x128xf32>
    %119 = math.tanh %118 : vector<16x128xf32>
    %cst_41 = arith.constant 1.000000e+00 : f32
    %120 = vector.broadcast %cst_41 : f32 to vector<16x128xf32>
    %121 = arith.addf %120, %119 : vector<16x128xf32>
    %122 = arith.mulf %111, %121 : vector<16x128xf32>
    %c712 = arith.constant 712 : index
    %c0_42 = arith.constant 0 : index
    %123 = vector.load %arg2[%c712, %c0_42] : memref<2232x128xf32, #tpu.memory_space<vmem>>, vector<128x128xf32>
    %cst_43 = arith.constant dense<0.000000e+00> : vector<16x128xf32>
    %124 = tpu.matmul %122, %123, %cst_43 {dimension_numbers = #tpu.dot_dimension_numbers<[1], [0], [0], [1], [0, 0, 1, 1], [], []>} : vector<16x128xf32>, vector<128x128xf32>, vector<16x128xf32> -> vector<16x128xf32>
    %c840 = arith.constant 840 : index
    %c0_44 = arith.constant 0 : index
    %125 = vector.load %arg2[%c840, %c0_44] : memref<2232x128xf32, #tpu.memory_space<vmem>>, vector<1x128xf32>
    %126 = vector.broadcast %125 : vector<1x128xf32> to vector<16x128xf32>
    %127 = arith.addf %124, %126 : vector<16x128xf32>
    %c848 = arith.constant 848 : index
    %c0_45 = arith.constant 0 : index
    %128 = vector.load %arg2[%c848, %c0_45] : memref<2232x128xf32, #tpu.memory_space<vmem>>, vector<128x128xf32>
    %cst_46 = arith.constant dense<0.000000e+00> : vector<16x128xf32>
    %129 = tpu.matmul %104, %128, %cst_46 {dimension_numbers = #tpu.dot_dimension_numbers<[1], [0], [0], [1], [0, 0, 1, 1], [], []>} : vector<16x128xf32>, vector<128x128xf32>, vector<16x128xf32> -> vector<16x128xf32>
    %c976 = arith.constant 976 : index
    %c0_47 = arith.constant 0 : index
    %130 = vector.load %arg2[%c976, %c0_47] : memref<2232x128xf32, #tpu.memory_space<vmem>>, vector<1x128xf32>
    %131 = vector.broadcast %130 : vector<1x128xf32> to vector<16x128xf32>
    %132 = arith.addf %129, %131 : vector<16x128xf32>
    %133 = arith.addf %127, %132 : vector<16x128xf32>
    %c984 = arith.constant 984 : index
    %c0_48 = arith.constant 0 : index
    %134 = vector.load %arg2[%c984, %c0_48] : memref<2232x128xf32, #tpu.memory_space<vmem>>, vector<1x128xf32>
    %c992 = arith.constant 992 : index
    %c0_49 = arith.constant 0 : index
    %135 = vector.load %arg2[%c992, %c0_49] : memref<2232x128xf32, #tpu.memory_space<vmem>>, vector<1x128xf32>
    %cst_50 = arith.constant dense<0.000000e+00> : vector<16xf32>
    %136 = vector.multi_reduction <add>, %133, %cst_50 [1] : vector<16x128xf32> to vector<16xf32>
    %137 = vector.shape_cast %136 : vector<16xf32> to vector<16x1xf32>
    %cst_51 = arith.constant 3.125000e-02 : f32
    %138 = vector.broadcast %cst_51 : f32 to vector<16x1xf32>
    %139 = arith.mulf %137, %138 : vector<16x1xf32>
    %140 = vector.broadcast %139 : vector<16x1xf32> to vector<16x128xf32>
    %141 = arith.subf %133, %140 : vector<16x128xf32>
    %142 = vector.broadcast %4 : vector<1x128xf32> to vector<16x128xf32>
    %143 = arith.mulf %141, %142 : vector<16x128xf32>
    %144 = arith.mulf %143, %143 : vector<16x128xf32>
    %cst_52 = arith.constant dense<0.000000e+00> : vector<16xf32>
    %145 = vector.multi_reduction <add>, %144, %cst_52 [1] : vector<16x128xf32> to vector<16xf32>
    %146 = vector.shape_cast %145 : vector<16xf32> to vector<16x1xf32>
    %cst_53 = arith.constant 3.125000e-02 : f32
    %147 = vector.broadcast %cst_53 : f32 to vector<16x1xf32>
    %148 = arith.mulf %146, %147 : vector<16x1xf32>
    %cst_54 = arith.constant 9.99999974E-6 : f32
    %149 = vector.broadcast %cst_54 : f32 to vector<16x1xf32>
    %150 = arith.addf %148, %149 : vector<16x1xf32>
    %151 = math.rsqrt %150 : vector<16x1xf32>
    %152 = vector.broadcast %151 : vector<16x1xf32> to vector<16x128xf32>
    %153 = arith.mulf %143, %152 : vector<16x128xf32>
    %154 = vector.broadcast %134 : vector<1x128xf32> to vector<16x128xf32>
    %155 = arith.mulf %153, %154 : vector<16x128xf32>
    %156 = vector.broadcast %135 : vector<1x128xf32> to vector<16x128xf32>
    %157 = arith.addf %155, %156 : vector<16x128xf32>
    %c1000 = arith.constant 1000 : index
    %c0_55 = arith.constant 0 : index
    %158 = vector.load %arg2[%c1000, %c0_55] : memref<2232x128xf32, #tpu.memory_space<vmem>>, vector<128x128xf32>
    %cst_56 = arith.constant dense<0.000000e+00> : vector<16x128xf32>
    %159 = tpu.matmul %157, %158, %cst_56 {dimension_numbers = #tpu.dot_dimension_numbers<[1], [0], [0], [1], [0, 0, 1, 1], [], []>} : vector<16x128xf32>, vector<128x128xf32>, vector<16x128xf32> -> vector<16x128xf32>
    %c1128 = arith.constant 1128 : index
    %c0_57 = arith.constant 0 : index
    %160 = vector.load %arg2[%c1128, %c0_57] : memref<2232x128xf32, #tpu.memory_space<vmem>>, vector<1x128xf32>
    %161 = vector.broadcast %160 : vector<1x128xf32> to vector<16x128xf32>
    %162 = arith.addf %159, %161 : vector<16x128xf32>
    %c1136 = arith.constant 1136 : index
    %c0_58 = arith.constant 0 : index
    %163 = vector.load %arg2[%c1136, %c0_58] : memref<2232x128xf32, #tpu.memory_space<vmem>>, vector<128x128xf32>
    %cst_59 = arith.constant dense<0.000000e+00> : vector<16x128xf32>
    %164 = tpu.matmul %157, %163, %cst_59 {dimension_numbers = #tpu.dot_dimension_numbers<[1], [0], [0], [1], [0, 0, 1, 1], [], []>} : vector<16x128xf32>, vector<128x128xf32>, vector<16x128xf32> -> vector<16x128xf32>
    %c1264 = arith.constant 1264 : index
    %c0_60 = arith.constant 0 : index
    %165 = vector.load %arg2[%c1264, %c0_60] : memref<2232x128xf32, #tpu.memory_space<vmem>>, vector<1x128xf32>
    %166 = vector.broadcast %165 : vector<1x128xf32> to vector<16x128xf32>
    %167 = arith.addf %164, %166 : vector<16x128xf32>
    %c1272 = arith.constant 1272 : index
    %c0_61 = arith.constant 0 : index
    %168 = vector.load %arg2[%c1272, %c0_61] : memref<2232x128xf32, #tpu.memory_space<vmem>>, vector<128x128xf32>
    %cst_62 = arith.constant dense<0.000000e+00> : vector<16x128xf32>
    %169 = tpu.matmul %157, %168, %cst_62 {dimension_numbers = #tpu.dot_dimension_numbers<[1], [0], [0], [1], [0, 0, 1, 1], [], []>} : vector<16x128xf32>, vector<128x128xf32>, vector<16x128xf32> -> vector<16x128xf32>
    %c1400 = arith.constant 1400 : index
    %c0_63 = arith.constant 0 : index
    %170 = vector.load %arg2[%c1400, %c0_63] : memref<2232x128xf32, #tpu.memory_space<vmem>>, vector<1x128xf32>
    %171 = vector.broadcast %170 : vector<1x128xf32> to vector<16x128xf32>
    %172 = arith.addf %169, %171 : vector<16x128xf32>
    %c1408 = arith.constant 1408 : index
    %c0_64 = arith.constant 0 : index
    %173 = vector.load %arg2[%c1408, %c0_64] : memref<2232x128xf32, #tpu.memory_space<vmem>>, vector<128x128xf32>
    %cst_65 = arith.constant dense<0.000000e+00> : vector<16x128xf32>
    %174 = tpu.matmul %157, %173, %cst_65 {dimension_numbers = #tpu.dot_dimension_numbers<[1], [0], [0], [1], [0, 0, 1, 1], [], []>} : vector<16x128xf32>, vector<128x128xf32>, vector<16x128xf32> -> vector<16x128xf32>
    %c1536 = arith.constant 1536 : index
    %c0_66 = arith.constant 0 : index
    %175 = vector.load %arg2[%c1536, %c0_66] : memref<2232x128xf32, #tpu.memory_space<vmem>>, vector<128x128xf32>
    %cst_67 = arith.constant dense<0.000000e+00> : vector<16x128xf32>
    %176 = tpu.matmul %162, %175, %cst_67 {dimension_numbers = #tpu.dot_dimension_numbers<[1], [0], [0], [1], [0, 0, 1, 1], [], []>} : vector<16x128xf32>, vector<128x128xf32>, vector<16x128xf32> -> vector<16x128xf32>
    %177 = arith.addf %174, %176 : vector<16x128xf32>
    %c1664 = arith.constant 1664 : index
    %c0_68 = arith.constant 0 : index
    %178 = vector.load %arg2[%c1664, %c0_68] : memref<2232x128xf32, #tpu.memory_space<vmem>>, vector<128x128xf32>
    %cst_69 = arith.constant dense<0.000000e+00> : vector<16x128xf32>
    %179 = tpu.matmul %167, %178, %cst_69 {dimension_numbers = #tpu.dot_dimension_numbers<[1], [0], [0], [1], [0, 0, 1, 1], [], []>} : vector<16x128xf32>, vector<128x128xf32>, vector<16x128xf32> -> vector<16x128xf32>
    %180 = arith.addf %177, %179 : vector<16x128xf32>
    %c1792 = arith.constant 1792 : index
    %c0_70 = arith.constant 0 : index
    %181 = vector.load %arg2[%c1792, %c0_70] : memref<2232x128xf32, #tpu.memory_space<vmem>>, vector<128x128xf32>
    %cst_71 = arith.constant dense<0.000000e+00> : vector<16x128xf32>
    %182 = tpu.matmul %172, %181, %cst_71 {dimension_numbers = #tpu.dot_dimension_numbers<[1], [0], [0], [1], [0, 0, 1, 1], [], []>} : vector<16x128xf32>, vector<128x128xf32>, vector<16x128xf32> -> vector<16x128xf32>
    %183 = arith.addf %180, %182 : vector<16x128xf32>
    %c1920 = arith.constant 1920 : index
    %c0_72 = arith.constant 0 : index
    %184 = vector.load %arg2[%c1920, %c0_72] : memref<2232x128xf32, #tpu.memory_space<vmem>>, vector<1x128xf32>
    %185 = vector.broadcast %184 : vector<1x128xf32> to vector<16x128xf32>
    %186 = arith.addf %183, %185 : vector<16x128xf32>
    %cst_73 = arith.constant 5.000000e-01 : f32
    %187 = vector.broadcast %cst_73 : f32 to vector<16x128xf32>
    %188 = arith.mulf %187, %186 : vector<16x128xf32>
    %cst_74 = arith.constant 4.471500e-02 : f32
    %189 = vector.broadcast %cst_74 : f32 to vector<16x128xf32>
    %190 = arith.mulf %189, %186 : vector<16x128xf32>
    %191 = arith.mulf %190, %186 : vector<16x128xf32>
    %192 = arith.mulf %191, %186 : vector<16x128xf32>
    %193 = arith.addf %186, %192 : vector<16x128xf32>
    %cst_75 = arith.constant 0.797884583 : f32
    %194 = vector.broadcast %cst_75 : f32 to vector<16x128xf32>
    %195 = arith.mulf %194, %193 : vector<16x128xf32>
    %196 = math.tanh %195 : vector<16x128xf32>
    %cst_76 = arith.constant 1.000000e+00 : f32
    %197 = vector.broadcast %cst_76 : f32 to vector<16x128xf32>
    %198 = arith.addf %197, %196 : vector<16x128xf32>
    %199 = arith.mulf %188, %198 : vector<16x128xf32>
    %c1928 = arith.constant 1928 : index
    %c0_77 = arith.constant 0 : index
    %200 = vector.load %arg2[%c1928, %c0_77] : memref<2232x128xf32, #tpu.memory_space<vmem>>, vector<1x128xf32>
    %c1936 = arith.constant 1936 : index
    %c0_78 = arith.constant 0 : index
    %201 = vector.load %arg2[%c1936, %c0_78] : memref<2232x128xf32, #tpu.memory_space<vmem>>, vector<1x128xf32>
    %cst_79 = arith.constant dense<0.000000e+00> : vector<16xf32>
    %202 = vector.multi_reduction <add>, %199, %cst_79 [1] : vector<16x128xf32> to vector<16xf32>
    %203 = vector.shape_cast %202 : vector<16xf32> to vector<16x1xf32>
    %cst_80 = arith.constant 3.125000e-02 : f32
    %204 = vector.broadcast %cst_80 : f32 to vector<16x1xf32>
    %205 = arith.mulf %203, %204 : vector<16x1xf32>
    %206 = vector.broadcast %205 : vector<16x1xf32> to vector<16x128xf32>
    %207 = arith.subf %199, %206 : vector<16x128xf32>
    %208 = vector.broadcast %4 : vector<1x128xf32> to vector<16x128xf32>
    %209 = arith.mulf %207, %208 : vector<16x128xf32>
    %210 = arith.mulf %209, %209 : vector<16x128xf32>
    %cst_81 = arith.constant dense<0.000000e+00> : vector<16xf32>
    %211 = vector.multi_reduction <add>, %210, %cst_81 [1] : vector<16x128xf32> to vector<16xf32>
    %212 = vector.shape_cast %211 : vector<16xf32> to vector<16x1xf32>
    %cst_82 = arith.constant 3.125000e-02 : f32
    %213 = vector.broadcast %cst_82 : f32 to vector<16x1xf32>
    %214 = arith.mulf %212, %213 : vector<16x1xf32>
    %cst_83 = arith.constant 9.99999974E-6 : f32
    %215 = vector.broadcast %cst_83 : f32 to vector<16x1xf32>
    %216 = arith.addf %214, %215 : vector<16x1xf32>
    %217 = math.rsqrt %216 : vector<16x1xf32>
    %218 = vector.broadcast %217 : vector<16x1xf32> to vector<16x128xf32>
    %219 = arith.mulf %209, %218 : vector<16x128xf32>
    %220 = vector.broadcast %200 : vector<1x128xf32> to vector<16x128xf32>
    %221 = arith.mulf %219, %220 : vector<16x128xf32>
    %222 = vector.broadcast %201 : vector<1x128xf32> to vector<16x128xf32>
    %223 = arith.addf %221, %222 : vector<16x128xf32>
    %c1944 = arith.constant 1944 : index
    %c0_84 = arith.constant 0 : index
    %224 = vector.load %arg2[%c1944, %c0_84] : memref<2232x128xf32, #tpu.memory_space<vmem>>, vector<128x128xf32>
    %cst_85 = arith.constant dense<0.000000e+00> : vector<16x128xf32>
    %225 = tpu.matmul %223, %224, %cst_85 {dimension_numbers = #tpu.dot_dimension_numbers<[1], [0], [0], [1], [0, 0, 1, 1], [], []>} : vector<16x128xf32>, vector<128x128xf32>, vector<16x128xf32> -> vector<16x128xf32>
    %c2072 = arith.constant 2072 : index
    %c0_86 = arith.constant 0 : index
    %226 = vector.load %arg2[%c2072, %c0_86] : memref<2232x128xf32, #tpu.memory_space<vmem>>, vector<1x128xf32>
    %227 = vector.broadcast %226 : vector<1x128xf32> to vector<16x128xf32>
    %228 = arith.addf %225, %227 : vector<16x128xf32>
    %cst_87 = arith.constant 5.000000e-01 : f32
    %229 = vector.broadcast %cst_87 : f32 to vector<16x128xf32>
    %230 = arith.mulf %229, %228 : vector<16x128xf32>
    %cst_88 = arith.constant 4.471500e-02 : f32
    %231 = vector.broadcast %cst_88 : f32 to vector<16x128xf32>
    %232 = arith.mulf %231, %228 : vector<16x128xf32>
    %233 = arith.mulf %232, %228 : vector<16x128xf32>
    %234 = arith.mulf %233, %228 : vector<16x128xf32>
    %235 = arith.addf %228, %234 : vector<16x128xf32>
    %cst_89 = arith.constant 0.797884583 : f32
    %236 = vector.broadcast %cst_89 : f32 to vector<16x128xf32>
    %237 = arith.mulf %236, %235 : vector<16x128xf32>
    %238 = math.tanh %237 : vector<16x128xf32>
    %cst_90 = arith.constant 1.000000e+00 : f32
    %239 = vector.broadcast %cst_90 : f32 to vector<16x128xf32>
    %240 = arith.addf %239, %238 : vector<16x128xf32>
    %241 = arith.mulf %230, %240 : vector<16x128xf32>
    %c2080 = arith.constant 2080 : index
    %c0_91 = arith.constant 0 : index
    %242 = vector.load %arg2[%c2080, %c0_91] : memref<2232x128xf32, #tpu.memory_space<vmem>>, vector<1x128xf32>
    %c2088 = arith.constant 2088 : index
    %c0_92 = arith.constant 0 : index
    %243 = vector.load %arg2[%c2088, %c0_92] : memref<2232x128xf32, #tpu.memory_space<vmem>>, vector<1x128xf32>
    %cst_93 = arith.constant dense<0.000000e+00> : vector<16xf32>
    %244 = vector.multi_reduction <add>, %241, %cst_93 [1] : vector<16x128xf32> to vector<16xf32>
    %245 = vector.shape_cast %244 : vector<16xf32> to vector<16x1xf32>
    %cst_94 = arith.constant 6.250000e-02 : f32
    %246 = vector.broadcast %cst_94 : f32 to vector<16x1xf32>
    %247 = arith.mulf %245, %246 : vector<16x1xf32>
    %248 = vector.broadcast %247 : vector<16x1xf32> to vector<16x128xf32>
    %249 = arith.subf %241, %248 : vector<16x128xf32>
    %250 = vector.broadcast %8 : vector<1x128xf32> to vector<16x128xf32>
    %251 = arith.mulf %249, %250 : vector<16x128xf32>
    %252 = arith.mulf %251, %251 : vector<16x128xf32>
    %cst_95 = arith.constant dense<0.000000e+00> : vector<16xf32>
    %253 = vector.multi_reduction <add>, %252, %cst_95 [1] : vector<16x128xf32> to vector<16xf32>
    %254 = vector.shape_cast %253 : vector<16xf32> to vector<16x1xf32>
    %cst_96 = arith.constant 6.250000e-02 : f32
    %255 = vector.broadcast %cst_96 : f32 to vector<16x1xf32>
    %256 = arith.mulf %254, %255 : vector<16x1xf32>
    %cst_97 = arith.constant 9.99999974E-6 : f32
    %257 = vector.broadcast %cst_97 : f32 to vector<16x1xf32>
    %258 = arith.addf %256, %257 : vector<16x1xf32>
    %259 = math.rsqrt %258 : vector<16x1xf32>
    %260 = vector.broadcast %259 : vector<16x1xf32> to vector<16x128xf32>
    %261 = arith.mulf %251, %260 : vector<16x128xf32>
    %262 = vector.broadcast %242 : vector<1x128xf32> to vector<16x128xf32>
    %263 = arith.mulf %261, %262 : vector<16x128xf32>
    %264 = vector.broadcast %243 : vector<1x128xf32> to vector<16x128xf32>
    %265 = arith.addf %263, %264 : vector<16x128xf32>
    %c2096 = arith.constant 2096 : index
    %c0_98 = arith.constant 0 : index
    %266 = vector.load %arg2[%c2096, %c0_98] : memref<2232x128xf32, #tpu.memory_space<vmem>>, vector<128x128xf32>
    %cst_99 = arith.constant dense<0.000000e+00> : vector<16x128xf32>
    %267 = tpu.matmul %265, %266, %cst_99 {dimension_numbers = #tpu.dot_dimension_numbers<[1], [0], [0], [1], [0, 0, 1, 1], [], []>} : vector<16x128xf32>, vector<128x128xf32>, vector<16x128xf32> -> vector<16x128xf32>
    %c2224 = arith.constant 2224 : index
    %c0_100 = arith.constant 0 : index
    %268 = vector.load %arg2[%c2224, %c0_100] : memref<2232x128xf32, #tpu.memory_space<vmem>>, vector<1x128xf32>
    %269 = vector.broadcast %268 : vector<1x128xf32> to vector<16x128xf32>
    %270 = arith.addf %267, %269 : vector<16x128xf32>
    %c0_101 = arith.constant 0 : index
    %c0_102 = arith.constant 0 : index
    %271 = vector.load %arg3[%c0_101, %c0_102] : memref<16x128xf32, #tpu.memory_space<vmem>>, vector<16x128xf32>
    tpu.vector_store %arg3[%c0_101, %c0_102], %270 {strides = array<i32>} : memref<16x128xf32, #tpu.memory_space<vmem>>, vector<16x128xf32>,
    return
  }
  func.func @transform_0(%arg0: i32) -> (i32, i32) {
    %c0_i32 = arith.constant 0 : i32
    %c0_i32_0 = arith.constant 0 : i32
    return %arg0, %c0_i32 : i32, i32
  }
  func.func @transform_1(%arg0: i32) -> (i32, i32) {
    %c0_i32 = arith.constant 0 : i32
    %c0_i32_0 = arith.constant 0 : i32
    %c0_i32_1 = arith.constant 0 : i32
    return %c0_i32, %c0_i32_0 : i32, i32
  }
  func.func @transform_2(%arg0: i32) -> (i32, i32) {
    %c0_i32 = arith.constant 0 : i32
    %c0_i32_0 = arith.constant 0 : i32
    return %arg0, %c0_i32 : i32, i32
  }
}

</mosaic_0001>

<bundles_post_ra>
// kernel: tpu_custom_call.1
= control target key start
LH: loop header
LB: loop body
LE: loop exit
PB: predicated region body
PF: predicated region fallthrough
CT: control target
= control target key end

     0   :  { %7 = vsyncpa [#allocation3], 0  ;;  %s2943_s0 = inlined_call_operand.hbm [shape: f32[16,128], index: 0, kind: input, shape index: {}]   ;;  %s2944_s1 = inlined_call_operand.hbm [shape: f32[2232,128], index: 1, kind: input, shape index: {}]   ;;  %s2945_s2 = inlined_call_operand.hbm [shape: f32[16,128], index: 2, kind: output, shape index: {}]  }
   0x1   :  { %8 = vsyncpa [#allocation6], 0 }
   0x2   :  { %9 = vsyncpa [#allocation4], 0  ;;  %s2866_s9 = smov [#allocation2]  }
   0x3   :  { %s15_s10 = sshll.u32 %s2866_s9, 4  ;;  %s16_s10 = int_to_ptr.vmem [resolvable:$true] %s15_s10 }
   0x4   :  { %s2808_s11 = scalar_lea.vmem %s16_s10, 256  ;;  %p2813_p1 = scmp.lt.s32.totalorder %s16_s10, %s16_s10 }
   0x5   :  { %p2809_p0 = scmp.ne.s32.totalorder %s16_s10, %s2808_s11  ;;  %p2814_p2 = scmp.lt.s32.totalorder %s2808_s11, %s2808_s11 }
   0x7   :  { %p2815_p3 = por %p2814_p2, %p2813_p1 }
   0x9   :  { %p2816_p4 = pnand %p2815_p3, %p2809_p0 }
   0xb   :  { %2819 = shalt.err (!%p2816_p4)
}
   0xc   :  { %s2867_s12 = smov 128   ;;  %s2868_s13 = smov 8  }
   0xd   :  { %21 = dma.hbm_to_vmem [thread:$0]  %s2943_s0, 256, %s16_s10, [#allocation3], %s2867_s12, %s2867_s12, %s2868_s13  }
   0xe   :  { %s2869_s16 = smov [#allocation5]  }
   0xf   :  { %s27_s17 = sshll.u32 %s2869_s16, 4  ;;  %s28_s17 = int_to_ptr.vmem [resolvable:$true] %s27_s17 }
  0x10   :  { %s2828_s18 = scalar_lea.vmem %s28_s17, 35712  ;;  %p2833_p6 = scmp.lt.s32.totalorder %s28_s17, %s28_s17 }
  0x11   :  { %p2829_p5 = scmp.ne.s32.totalorder %s28_s17, %s2828_s18  ;;  %p2834_p7 = scmp.lt.s32.totalorder %s2828_s18, %s2828_s18 }
  0x13   :  { %p2835_p8 = por %p2834_p7, %p2833_p6 }
  0x15   :  { %p2836_p9 = pnand %p2835_p8, %p2829_p5 }
  0x17   :  { %2839 = shalt.err (!%p2836_p9)
}
  0x18   :  { %33 = dma.hbm_to_vmem [thread:$0]  %s2944_s1, 35712, %s28_s17, [#allocation6], %s2867_s12, %s2867_s12, %s2868_s13  }
  0x19   :  { %2860 = dma.done.wait [#allocation3], 256  }
  0x1a   :  { %2861 = vsyncadd [#allocation3], 4294967040 }
  0x1b   :  { %2862 = dma.done.wait [#allocation6], 35712  }
  0x1c   :  { %2863 = vsyncadd [#allocation6], 4294931584  ;;  %v65_v0 = vld [vmem:[#allocation5 + $0x78] sm:$0xff]  ;;  %v64_v1 = vld [vmem:[#allocation5 + $0x70] sm:$0xff]  ;;  %v40_v44 = vlaneseq  ;;  %v2870_v48 = vmov 0.0   ;;  %s2871_s0 = smov [#allocation7]  }
  0x1d   :  { %2194 = vmatprep.subr.mxu0 %v65_v0  ;;  %v63_v2 = vld [vmem:[#allocation5 + $0x68] sm:$0xff]  ;;  %v62_v3 = vld [vmem:[#allocation5 + $0x60] sm:$0xff]  ;;  %v48_v4 = vld [vmem:[#allocation2] sm:$0xff]  ;;  %s1868_s1 = sshll.u32 %s2871_s0, 4  ;;  %s1869_s1 = int_to_ptr.vmem [resolvable:$true] %s1868_s1 }
  0x1e   :  { %2195 = vmatpush3.msra.mxu0 %v65_v0  ;;  %v61_v5 = vld [vmem:[#allocation5 + $0x58] sm:$0xff]  ;;  %2226 = vmatprep.mubr.f32.mxu0 %v48_v4  ;;  %v60_v6 = vld [vmem:[#allocation5 + $0x50] sm:$0xff]  ;;  %v59_v7 = vld [vmem:[#allocation5 + $0x48] sm:$0xff]  ;;  %v2899_v45 = vand.u32 127, %v40_v44  ;;  %s2840_s21 = scalar_lea.vmem %s1869_s1, 256  ;;  %p2845_p11 = scmp.lt.s32.totalorder %s1869_s1, %s1869_s1 }
  0x1f   :  { %2196 = vmatprep.subr.mxu0 %v64_v1  ;;  %v58_v8 = vld [vmem:[#allocation5 + $0x40] sm:$0xff]  ;;  %v57_v9 = vld [vmem:[#allocation5 + $0x38] sm:$0xff]  ;;  %v56_v10 = vld [vmem:[#allocation5 + $0x30] sm:$0xff]  ;;  %p2841_p10 = scmp.ne.s32.totalorder %s1869_s1, %s2840_s21  ;;  %p2846_p12 = scmp.lt.s32.totalorder %s2840_s21, %s2840_s21 }
  0x20   :  { %2197 = vmatpush3.msra.mxu0 %v64_v1  ;;  %v55_v11 = vld [vmem:[#allocation5 + $0x28] sm:$0xff]  ;;  %v54_v12 = vld [vmem:[#allocation5 + $0x20] sm:$0xff]  ;;  %v53_v13 = vld [vmem:[#allocation5 + $0x18] sm:$0xff]  ;;  %vm42_vm0 = vcmp.lt.s32.totalorder %v2899_v45, 32  ;;  %vm45_vm1 = vcmp.lt.s32.totalorder %v2899_v45, 16 }
  0x21   :  { %2198 = vmatprep.subr.mxu0 %v63_v2  ;;  %v52_v14 = vld [vmem:[#allocation5 + $0x10] sm:$0xff]  ;;  %v51_v15 = vld [vmem:[#allocation5 + $0x8] sm:$0xff]  ;;  %v50_v16 = vld [vmem:[#allocation5] sm:$0xff]  ;;  %v2903_v49 = vsel %vm42_vm0, 1.0, %v2870_v48  ;;  %p2847_p13 = por %p2846_p12, %p2845_p11 }
  0x22   :  { %2199 = vmatpush3.msra.mxu0 %v63_v2  ;;  %v49_v17 = vld [vmem:[#allocation2 + $0x8] sm:$0xff]  ;;  %v1883_v18 = vld [vmem:[#allocation5 + $0x80] ss:$0 sm:$0xff]  ;;  %v217_v41 = vld [vmem:[#allocation5 + $0x110] sm:$0xff] }
  0x23   :  { %2200 = vmatprep.subr.mxu0 %v62_v3  ;;  %v216_v42 = vld [vmem:[#allocation5 + $0x108] sm:$0xff]  ;;  %2229 = vmatprep.subr.mxu1 %v217_v41  ;;  %v215_v43 = vld [vmem:[#allocation5 + $0x100] sm:$0xff]  ;;  %v214_v58 = vld [vmem:[#allocation5 + $0xf8] sm:$0xff]  ;;  %p2848_p0 = pnand %p2847_p13, %p2841_p10 }
  0x24   :  { %2201 = vmatpush3.msra.mxu0 %v62_v3  ;;  %2230 = vmatpush3.msra.mxu1 %v217_v41  ;;  %v213_v59 = vld [vmem:[#allocation5 + $0xf0] sm:$0xff]  ;;  %v212_v60 = vld [vmem:[#allocation5 + $0xe8] sm:$0xff]  ;;  %v211_v61 = vld [vmem:[#allocation5 + $0xe0] sm:$0xff] }
  0x25   :  { %2202 = vmatprep.subr.mxu0 %v61_v5  ;;  %2231 = vmatprep.subr.mxu1 %v216_v42  ;;  %v210_v62 = vld [vmem:[#allocation5 + $0xd8] sm:$0xff]  ;;  %v209_v63 = vld [vmem:[#allocation5 + $0xd0] sm:$0xff]  ;;  %v208_v0 = vld [vmem:[#allocation5 + $0xc8] sm:$0xff] }
  0x26   :  { %2203 = vmatpush3.msra.mxu0 %v61_v5  ;;  %2232 = vmatpush3.msra.mxu1 %v216_v42  ;;  %v207_v1 = vld [vmem:[#allocation5 + $0xc0] sm:$0xff]  ;;  %v206_v2 = vld [vmem:[#allocation5 + $0xb8] sm:$0xff]  ;;  %v205_v3 = vld [vmem:[#allocation5 + $0xb0] sm:$0xff] }
  0x27   :  { %2204 = vmatprep.subr.mxu0 %v60_v6  ;;  %2233 = vmatprep.subr.mxu1 %v215_v43  ;;  %v204_v4 = vld [vmem:[#allocation5 + $0xa8] sm:$0xff]  ;;  %v203_v5 = vld [vmem:[#allocation5 + $0xa0] sm:$0xff]  ;;  %v326_v44 = vld [vmem:[#allocation5 + $0x170] sm:$0xff] }
  0x28   :  { %2205 = vmatpush3.msra.mxu0 %v60_v6  ;;  %2234 = vmatpush3.msra.mxu1 %v215_v43  ;;  %v202_v6 = vld [vmem:[#allocation5 + $0x98] sm:$0xff]  ;;  %v329_v41 = vld [vmem:[#allocation5 + $0x188] sm:$0xff]  ;;  %v328_v42 = vld [vmem:[#allocation5 + $0x180] sm:$0xff] }
  0x29   :  { %2206 = vmatprep.subr.mxu0 %v59_v7  ;;  %2235 = vmatprep.subr.mxu1 %v214_v58  ;;  %v327_v43 = vld [vmem:[#allocation5 + $0x178] sm:$0xff]  ;;  %v1775_v45 = vld [vmem:[#allocation5 + $0x880] sm:$0xff] }
  0x2a   :  { %2207 = vmatpush3.msra.mxu0 %v59_v7  ;;  %2236 = vmatpush3.msra.mxu1 %v214_v58  ;;  %v427_v7 = vld [vmem:[#allocation5 + $0x220] sm:$0xff]  ;;  %v1886_v58 = vld [vmem:[#allocation5 + $0x118] ss:$0 sm:$0xff] }
  0x2b   :  { %2208 = vmatprep.subr.mxu0 %v58_v8  ;;  %2237 = vmatprep.subr.mxu1 %v213_v59 }
  0x2c   :  { %2209 = vmatpush3.msra.mxu0 %v58_v8  ;;  %2238 = vmatpush3.msra.mxu1 %v213_v59 }
  0x2d   :  { %2210 = vmatprep.subr.mxu0 %v57_v9  ;;  %2239 = vmatprep.subr.mxu1 %v212_v60 }
  0x2e   :  { %2211 = vmatpush3.msra.mxu0 %v57_v9  ;;  %2240 = vmatpush3.msra.mxu1 %v212_v60 }
  0x2f   :  { %2212 = vmatprep.subr.mxu0 %v56_v10  ;;  %2241 = vmatprep.subr.mxu1 %v211_v61 }
  0x30   :  { %2213 = vmatpush3.msra.mxu0 %v56_v10  ;;  %2242 = vmatpush3.msra.mxu1 %v211_v61 }
  0x31   :  { %2214 = vmatprep.subr.mxu0 %v55_v11  ;;  %2243 = vmatprep.subr.mxu1 %v210_v62 }
  0x32   :  { %2215 = vmatpush3.msra.mxu0 %v55_v11  ;;  %2244 = vmatpush3.msra.mxu1 %v210_v62 }
  0x33   :  { %2216 = vmatprep.subr.mxu0 %v54_v12  ;;  %2245 = vmatprep.subr.mxu1 %v209_v63 }
  0x34   :  { %2217 = vmatpush3.msra.mxu0 %v54_v12  ;;  %2246 = vmatpush3.msra.mxu1 %v209_v63 }
  0x35   :  { %2218 = vmatprep.subr.mxu0 %v53_v13  ;;  %2247 = vmatprep.subr.mxu1 %v208_v0 }
  0x36   :  { %2219 = vmatpush3.msra.mxu0 %v53_v13  ;;  %2248 = vmatpush3.msra.mxu1 %v208_v0 }
  0x37   :  { %2220 = vmatprep.subr.mxu0 %v52_v14  ;;  %2249 = vmatprep.subr.mxu1 %v207_v1 }
  0x38   :  { %2221 = vmatpush3.msra.mxu0 %v52_v14  ;;  %2250 = vmatpush3.msra.mxu1 %v207_v1 }
  0x39   :  { %2222 = vmatprep.subr.mxu0 %v51_v15  ;;  %2251 = vmatprep.subr.mxu1 %v206_v2 }
  0x3a   :  { %2223 = vmatpush3.msra.mxu0 %v51_v15  ;;  %2252 = vmatpush3.msra.mxu1 %v206_v2  ;;  %v1884_v15 = vld [vmem:[#allocation5 + $0x88] ss:$0 sm:$0xff] }
  0x3b   :  { %2224 = vmatprep.subr.mxu0 %v50_v16  ;;  %2253 = vmatprep.subr.mxu1 %v205_v3 }
  0x3c   :  { %2225 = vmatpush3.msra.mxu0 %v50_v16  ;;  %2254 = vmatpush3.msra.mxu1 %v205_v3 }
  0x3d   :  { %2227 = vmatmul.mubr.f32.vlgmr.msra.gmra.mxu0 %v49_v17  ;;  %2255 = vmatprep.subr.mxu1 %v204_v4  ;;  %v1885_v17 = vld [vmem:[#allocation5 + $0x90] ss:$0 sm:$0xff] }
  0x3e   :  { %2256 = vmatpush3.msra.mxu1 %v204_v4 }
  0x3f   :  { %2257 = vmatprep.subr.mxu1 %v203_v5 }
  0x40   :  { %2258 = vmatpush3.msra.mxu1 %v203_v5 }
  0x41   :  { %2259 = vmatprep.subr.mxu1 %v202_v6 }
  0x42   :  { %2260 = vmatpush3.msra.mxu1 %v202_v6 }
  0x43   :  { %2299 = vmatprep.subr.mxu1 %v427_v7 }
  0xfd   :  { %v2228_v19 = vpop.f32.mrf.mxu0 }
  0xfe   :  { %v143_v20 = vadd.f32 %v2228_v19, %v1883_v18 }
  0xff   :  { %v137_v21 = vpop.f32.mrf.mxu0 }
 0x100   :  { %v149_v22 = vmul.f32 0.044715, %v143_v20  ;;  %v138_v23 = vadd.f32 %v1883_v18, %v137_v21  ;;  %v147_v39 = vmul.f32 0.5, %v143_v20 }
 0x102   :  { %v148_v24 = vmul.f32 0.044715, %v138_v23  ;;  %v151_v25 = vmul.f32 %v149_v22, %v143_v20  ;;  %v146_v35 = vmul.f32 0.5, %v138_v23 }
 0x104   :  { %v150_v26 = vmul.f32 %v148_v24, %v138_v23  ;;  %v153_v27 = vmul.f32 %v151_v25, %v143_v20  ;;  %v426_v24 = vld [vmem:[#allocation5 + $0x218] sm:$0xff]  ;;  %v425_v25 = vld [vmem:[#allocation5 + $0x210] sm:$0xff] }
 0x106   :  { %v152_v28 = vmul.f32 %v150_v26, %v138_v23  ;;  %v155_v29 = vadd.f32 %v153_v27, %v143_v20  ;;  %v424_v26 = vld [vmem:[#allocation5 + $0x208] sm:$0xff]  ;;  %v423_v27 = vld [vmem:[#allocation5 + $0x200] sm:$0xff] }
 0x108   :  { %v154_v30 = vadd.f32 %v152_v28, %v138_v23  ;;  %v157_v31 = vmul.f32 0.7978846, %v155_v29  ;;  %v422_v28 = vld [vmem:[#allocation5 + $0x1f8] sm:$0xff]  ;;  %v421_v29 = vld [vmem:[#allocation5 + $0x1f0] sm:$0xff] }
 0x10a   :  { %v156_v32 = vmul.f32 0.7978846, %v154_v30  ;;  %2760 = vtanh.f32 %v157_v31  ;;  %v420_v30 = vld [vmem:[#allocation5 + $0x1e8] sm:$0xff]  ;;  %v419_v31 = vld [vmem:[#allocation5 + $0x1e0] sm:$0xff] }
 0x10c   :  { %2762 = vtanh.f32 %v156_v32  ;;  %v418_v32 = vld [vmem:[#allocation5 + $0x1d8] sm:$0xff] }
 0x117   :  { %v2761_v33 = vpop.eup %2760 }
 0x118   :  { %v161_v38 = vadd.f32 1.0, %v2761_v33  ;;  %v417_v33 = vld [vmem:[#allocation5 + $0x1d0] sm:$0xff] }
 0x119   :  { %v2763_v34 = vpop.eup %2762 }
 0x11a   :  { %v160_v36 = vadd.f32 1.0, %v2763_v34  ;;  %v163_v40 = vmul.f32 %v161_v38, %v147_v39  ;;  %v416_v34 = vld [vmem:[#allocation5 + $0x1c8] sm:$0xff]  ;;  %v331_v39 = vld [vmem:[#allocation5 + $0x198] sm:$0xff] }
 0x11b   :  { %v412_v38 = vld [vmem:[#allocation5 + $0x1a8] sm:$0xff]  ;;  %2264 = vmatprep.subr.mxu0 %v331_v39 }
 0x11c   :  { %v162_v37 = vmul.f32 %v160_v36, %v146_v35  ;;  %v415_v35 = vld [vmem:[#allocation5 + $0x1c0] sm:$0xff]  ;;  %v414_v36 = vld [vmem:[#allocation5 + $0x1b8] sm:$0xff]  ;;  %2265 = vmatpush3.msra.mxu0 %v331_v39 }
 0x11e   :  { %166 = vadd.xlane.f32.xlu0 %v162_v37 }
 0x122   :  { %168 = vadd.xlane.f32.xlu0 %v163_v40 }
 0x1a7   :  { %v167_v46 = vpop.xlane.xlu0 %166 }
 0x1a8   :  { %v170_v47 = vmul.f32 0.03125, %v167_v46  ;;  %v325_v46 = vld [vmem:[#allocation5 + $0x168] sm:$0xff] }
 0x1aa   :  { %v172_v50 = vsub.f32 %v162_v37, %v170_v47  ;;  %v413_v37 = vld [vmem:[#allocation5 + $0x1b0] sm:$0xff]  ;;  %v324_v47 = vld [vmem:[#allocation5 + $0x160] sm:$0xff] }
 0x1ab   :  { %v169_v51 = vpop.xlane.xlu0 %168 }
 0x1ac   :  { %v171_v52 = vmul.f32 0.03125, %v169_v51  ;;  %v174_v53 = vmul.f32 %v2903_v49, %v172_v50  ;;  %v323_v50 = vld [vmem:[#allocation5 + $0x158] sm:$0xff]  ;;  %v322_v51 = vld [vmem:[#allocation5 + $0x150] sm:$0xff] }
 0x1ae   :  { %v173_v54 = vsub.f32 %v163_v40, %v171_v52  ;;  %v176_v55 = vmul.f32 %v174_v53, %v174_v53  ;;  %v330_v40 = vld [vmem:[#allocation5 + $0x190] sm:$0xff]  ;;  %v321_v52 = vld [vmem:[#allocation5 + $0x148] sm:$0xff] }
 0x1af   :  { %2266 = vmatprep.subr.mxu0 %v330_v40 }
 0x1b0   :  { %178 = vadd.xlane.f32.xlu1 %v176_v55  ;;  %v175_v56 = vmul.f32 %v2903_v49, %v173_v54  ;;  %2267 = vmatpush3.msra.mxu0 %v330_v40  ;;  %v319_v54 = vld [vmem:[#allocation5 + $0x138] sm:$0xff]  ;;  %v318_v55 = vld [vmem:[#allocation5 + $0x130] sm:$0xff] }
 0x1b1   :  { %2268 = vmatprep.subr.mxu0 %v329_v41 }
 0x1b2   :  { %v177_v57 = vmul.f32 %v175_v56, %v175_v56  ;;  %2269 = vmatpush3.msra.mxu0 %v329_v41 }
 0x1b3   :  { %2270 = vmatprep.subr.mxu0 %v328_v42 }
 0x1b4   :  { %180 = vadd.xlane.f32.xlu1 %v177_v57  ;;  %2271 = vmatpush3.msra.mxu0 %v328_v42  ;;  %v316_v57 = vld [vmem:[#allocation5 + $0x120] sm:$0xff] }
 0x1b5   :  { %2272 = vmatprep.subr.mxu0 %v327_v43  ;;  %v560_v42 = vld [vmem:[#allocation5 + $0x2a0] sm:$0xff] }
 0x1b6   :  { %2273 = vmatpush3.msra.mxu0 %v327_v43  ;;  %v559_v43 = vld [vmem:[#allocation5 + $0x298] sm:$0xff] }
 0x1b7   :  { %2274 = vmatprep.subr.mxu0 %v326_v44 }
 0x1b8   :  { %2275 = vmatpush3.msra.mxu0 %v326_v44  ;;  %v558_v44 = vld [vmem:[#allocation5 + $0x290] sm:$0xff] }
 0x1b9   :  { %2276 = vmatprep.subr.mxu0 %v325_v46 }
 0x1ba   :  { %2277 = vmatpush3.msra.mxu0 %v325_v46  ;;  %v557_v46 = vld [vmem:[#allocation5 + $0x288] sm:$0xff] }
 0x1bb   :  { %2278 = vmatprep.subr.mxu0 %v324_v47 }
 0x1bc   :  { %2279 = vmatpush3.msra.mxu0 %v324_v47  ;;  %v556_v47 = vld [vmem:[#allocation5 + $0x280] sm:$0xff] }
 0x1bd   :  { %2280 = vmatprep.subr.mxu0 %v323_v50 }
 0x1be   :  { %2281 = vmatpush3.msra.mxu0 %v323_v50  ;;  %v555_v50 = vld [vmem:[#allocation5 + $0x278] sm:$0xff] }
 0x1bf   :  { %2282 = vmatprep.subr.mxu0 %v322_v51 }
 0x1c0   :  { %2283 = vmatpush3.msra.mxu0 %v322_v51  ;;  %v554_v51 = vld [vmem:[#allocation5 + $0x270] sm:$0xff] }
 0x1c1   :  { %2284 = vmatprep.subr.mxu0 %v321_v52 }
 0x1c2   :  { %2285 = vmatpush3.msra.mxu0 %v321_v52  ;;  %v553_v52 = vld [vmem:[#allocation5 + $0x268] sm:$0xff] }
 0x239   :  { %v179_v8 = vpop.xlane.xlu1 %178 }
 0x23a   :  { %v182_v9 = vmul.f32 0.03125, %v179_v8 }
 0x23c   :  { %v184_v10 = vadd.f32 1e-05, %v182_v9 }
 0x23d   :  { %v181_v11 = vpop.xlane.xlu1 %180 }
 0x23e   :  { %2764 = vrsqrt.f32 %v184_v10  ;;  %v183_v12 = vmul.f32 0.03125, %v181_v11 }
 0x240   :  { %v185_v13 = vadd.f32 1e-05, %v183_v12 }
 0x242   :  { %2766 = vrsqrt.f32 %v185_v13 }
 0x24b   :  { %v2765_v14 = vpop.eup %2764 }
 0x24c   :  { %v188_v16 = vmul.f32 %v2765_v14, %v174_v53  ;;  %v320_v53 = vld [vmem:[#allocation5 + $0x140] sm:$0xff] }
 0x24d   :  { %2286 = vmatprep.subr.mxu0 %v320_v53 }
 0x24e   :  { %v194_v18 = vmul.f32 %v1884_v15, %v188_v16  ;;  %2287 = vmatpush3.msra.mxu0 %v320_v53  ;;  %v552_v53 = vld [vmem:[#allocation5 + $0x260] sm:$0xff] }
 0x24f   :  { %v2767_v19 = vpop.eup %2766  ;;  %2288 = vmatprep.subr.mxu0 %v319_v54 }
 0x250   :  { %v189_v20 = vmul.f32 %v2767_v19, %v175_v56  ;;  %v200_v21 = vadd.f32 %v1885_v17, %v194_v18  ;;  %2289 = vmatpush3.msra.mxu0 %v319_v54  ;;  %v317_v56 = vld [vmem:[#allocation5 + $0x128] sm:$0xff]  ;;  %v1887_v19 = vld [vmem:[#allocation5 + $0x1a0] ss:$0 sm:$0xff]  ;;  %v551_v54 = vld [vmem:[#allocation5 + $0x258] sm:$0xff] }
 0x251   :  { %2290 = vmatprep.subr.mxu0 %v318_v55  ;;  %v1888_v18 = vld [vmem:[#allocation5 + $0x228] ss:$0 sm:$0xff] }
 0x252   :  { %v195_v22 = vmul.f32 %v1884_v15, %v189_v20  ;;  %2261 = vmatprep.mubr.f32.mxu1 %v200_v21  ;;  %2291 = vmatpush3.msra.mxu0 %v318_v55  ;;  %v550_v55 = vld [vmem:[#allocation5 + $0x250] sm:$0xff] }
 0x253   :  { %2292 = vmatprep.subr.mxu0 %v317_v56 }
 0x254   :  { %v201_v23 = vadd.f32 %v1885_v17, %v195_v22  ;;  %2293 = vmatpush3.msra.mxu0 %v317_v56  ;;  %v549_v56 = vld [vmem:[#allocation5 + $0x248] sm:$0xff] }
 0x255   :  { %2294 = vmatprep.subr.mxu0 %v316_v57 }
 0x256   :  { %2262 = vmatmul.mubr.f32.vlgmr.msra.gmra.mxu1 %v201_v23  ;;  %2295 = vmatpush3.msra.mxu0 %v316_v57  ;;  %v548_v57 = vld [vmem:[#allocation5 + $0x240] sm:$0xff] }
 0x257   :  { %2300 = vmatpush3.msra.mxu1 %v427_v7  ;;  %2331 = vmatprep.mubr.f32.mxu1 %v200_v21 }
 0x258   :  { %2301 = vmatprep.subr.mxu1 %v426_v24 }
 0x259   :  { %2302 = vmatpush3.msra.mxu1 %v426_v24 }
 0x25a   :  { %2303 = vmatprep.subr.mxu1 %v425_v25 }
 0x25b   :  { %2304 = vmatpush3.msra.mxu1 %v425_v25 }
 0x25c   :  { %2305 = vmatprep.subr.mxu1 %v424_v26 }
 0x25d   :  { %2306 = vmatpush3.msra.mxu1 %v424_v26 }
 0x25e   :  { %2307 = vmatprep.subr.mxu1 %v423_v27 }
 0x25f   :  { %2308 = vmatpush3.msra.mxu1 %v423_v27 }
 0x260   :  { %2309 = vmatprep.subr.mxu1 %v422_v28 }
 0x261   :  { %2310 = vmatpush3.msra.mxu1 %v422_v28 }
 0x262   :  { %2311 = vmatprep.subr.mxu1 %v421_v29 }
 0x263   :  { %2312 = vmatpush3.msra.mxu1 %v421_v29  ;;  %v563_v29 = vld [vmem:[#allocation5 + $0x2b8] sm:$0xff] }
 0x264   :  { %2313 = vmatprep.subr.mxu1 %v420_v30  ;;  %2334 = vmatprep.subr.mxu0 %v563_v29 }
 0x265   :  { %2314 = vmatpush3.msra.mxu1 %v420_v30  ;;  %v562_v30 = vld [vmem:[#allocation5 + $0x2b0] sm:$0xff] }
 0x266   :  { %2315 = vmatprep.subr.mxu1 %v419_v31 }
 0x267   :  { %2316 = vmatpush3.msra.mxu1 %v419_v31  ;;  %v561_v31 = vld [vmem:[#allocation5 + $0x2a8] sm:$0xff] }
 0x268   :  { %2317 = vmatprep.subr.mxu1 %v418_v32 }
 0x269   :  { %2318 = vmatpush3.msra.mxu1 %v418_v32 }
 0x26a   :  { %2319 = vmatprep.subr.mxu1 %v417_v33 }
 0x26b   :  { %2320 = vmatpush3.msra.mxu1 %v417_v33 }
 0x26c   :  { %2321 = vmatprep.subr.mxu1 %v416_v34 }
 0x26d   :  { %2322 = vmatpush3.msra.mxu1 %v416_v34 }
 0x26e   :  { %2323 = vmatprep.subr.mxu1 %v415_v35 }
 0x26f   :  { %2324 = vmatpush3.msra.mxu1 %v415_v35 }
 0x270   :  { %2325 = vmatprep.subr.mxu1 %v414_v36 }
 0x271   :  { %2326 = vmatpush3.msra.mxu1 %v414_v36 }
 0x272   :  { %2327 = vmatprep.subr.mxu1 %v413_v37 }
 0x273   :  { %2328 = vmatpush3.msra.mxu1 %v413_v37 }
 0x274   :  { %2329 = vmatprep.subr.mxu1 %v412_v38 }
 0x275   :  { %2330 = vmatpush3.msra.mxu1 %v412_v38 }
 0x276   :  { %2332 = vmatmul.mubr.f32.vlgmr.msra.gmra.mxu1 %v201_v23 }
 0x316   :  { %v2263_v59 = vpop.f32.mrf.mxu1 }
 0x317   :  { %v295_v60 = vadd.f32 %v2263_v59, %v1886_v58 }
 0x318   :  { %v289_v61 = vpop.f32.mrf.mxu1 }
 0x319   :  { %v301_v62 = vmul.f32 0.044715, %v295_v60  ;;  %v290_v63 = vadd.f32 %v1886_v58, %v289_v61  ;;  %v299_v14 = vmul.f32 0.5, %v295_v60  ;;  %v773_v58 = vld [vmem:[#allocation5 + $0x3c8] sm:$0xff] }
 0x31b   :  { %v303_v0 = vmul.f32 %v301_v62, %v295_v60  ;;  %v300_v1 = vmul.f32 0.044715, %v290_v63  ;;  %v298_v12 = vmul.f32 0.5, %v290_v63 }
 0x31d   :  { %v305_v2 = vmul.f32 %v303_v0, %v295_v60  ;;  %v302_v3 = vmul.f32 %v300_v1, %v290_v63 }
 0x31f   :  { %v307_v4 = vadd.f32 %v305_v2, %v295_v60  ;;  %v304_v5 = vmul.f32 %v302_v3, %v290_v63  ;;  %v1889_v2 = vld [vmem:[#allocation5 + $0x230] ss:$0 sm:$0xff] }
 0x321   :  { %v306_v6 = vadd.f32 %v304_v5, %v290_v63  ;;  %v309_v7 = vmul.f32 0.7978846, %v307_v4 }
 0x323   :  { %v308_v8 = vmul.f32 0.7978846, %v306_v6  ;;  %2768 = vtanh.f32 %v309_v7  ;;  %v1890_v7 = vld [vmem:[#allocation5 + $0x238] ss:$0 sm:$0xff] }
 0x325   :  { %2770 = vtanh.f32 %v308_v8 }
 0x330   :  { %v2769_v9 = vpop.eup %2768 }
 0x331   :  { %v313_v11 = vadd.f32 1.0, %v2769_v9 }
 0x332   :  { %v2771_v10 = vpop.eup %2770 }
 0x333   :  { %v312_v13 = vadd.f32 1.0, %v2771_v10  ;;  %v315_v16 = vmul.f32 %v313_v11, %v299_v14  ;;  %v772_v11 = vld [vmem:[#allocation5 + $0x3c0] sm:$0xff]  ;;  %v769_v14 = vld [vmem:[#allocation5 + $0x3a8] sm:$0xff] }
 0x335   :  { %v314_v15 = vmul.f32 %v312_v13, %v298_v12  ;;  %v771_v12 = vld [vmem:[#allocation5 + $0x3b8] sm:$0xff]  ;;  %v770_v13 = vld [vmem:[#allocation5 + $0x3b0] sm:$0xff] }
 0x336   :  { %v2333_v17 = vpop.f32.mrf.mxu1 }
 0x337   :  { %2296 = vmatprep.mubr.f32.mxu0 %v314_v15  ;;  %v505_v22 = vadd.f32 %v2333_v17, %v1888_v18  ;;  %v768_v15 = vld [vmem:[#allocation5 + $0x3a0] sm:$0xff]  ;;  %v766_v17 = vld [vmem:[#allocation5 + $0x390] sm:$0xff] }
 0x338   :  { %2297 = vmatmul.mubr.f32.vlgmr.msra.gmra.mxu0 %v315_v16  ;;  %v499_v20 = vpop.f32.mrf.mxu1  ;;  %v767_v16 = vld [vmem:[#allocation5 + $0x398] sm:$0xff] }
 0x339   :  { %v500_v25 = vadd.f32 %v1888_v18, %v499_v20  ;;  %2335 = vmatpush3.msra.mxu0 %v563_v29  ;;  %v765_v18 = vld [vmem:[#allocation5 + $0x388] sm:$0xff]  ;;  %v763_v20 = vld [vmem:[#allocation5 + $0x378] sm:$0xff] }
 0x33a   :  { %2336 = vmatprep.subr.mxu0 %v562_v30  ;;  %v674_v29 = vld [vmem:[#allocation5 + $0x328] sm:$0xff] }
 0x33b   :  { %2337 = vmatpush3.msra.mxu0 %v562_v30  ;;  %v673_v30 = vld [vmem:[#allocation5 + $0x320] sm:$0xff] }
 0x33c   :  { %2338 = vmatprep.subr.mxu0 %v561_v31 }
 0x33d   :  { %2339 = vmatpush3.msra.mxu0 %v561_v31  ;;  %v672_v31 = vld [vmem:[#allocation5 + $0x318] sm:$0xff] }
 0x33e   :  { %2340 = vmatprep.subr.mxu0 %v560_v42 }
 0x33f   :  { %2341 = vmatpush3.msra.mxu0 %v560_v42  ;;  %v1891_v42 = vld [vmem:[#allocation5 + $0x2c0] ss:$0 sm:$0xff] }
 0x340   :  { %2342 = vmatprep.subr.mxu0 %v559_v43 }
 0x341   :  { %2343 = vmatpush3.msra.mxu0 %v559_v43 }
 0x342   :  { %2344 = vmatprep.subr.mxu0 %v558_v44 }
 0x343   :  { %2345 = vmatpush3.msra.mxu0 %v558_v44 }
 0x344   :  { %2346 = vmatprep.subr.mxu0 %v557_v46 }
 0x345   :  { %2347 = vmatpush3.msra.mxu0 %v557_v46 }
 0x346   :  { %2348 = vmatprep.subr.mxu0 %v556_v47 }
 0x347   :  { %2349 = vmatpush3.msra.mxu0 %v556_v47 }
 0x348   :  { %2350 = vmatprep.subr.mxu0 %v555_v50 }
 0x349   :  { %2351 = vmatpush3.msra.mxu0 %v555_v50 }
 0x34a   :  { %2352 = vmatprep.subr.mxu0 %v554_v51 }
 0x34b   :  { %2353 = vmatpush3.msra.mxu0 %v554_v51 }
 0x34c   :  { %2354 = vmatprep.subr.mxu0 %v553_v52 }
 0x34d   :  { %2355 = vmatpush3.msra.mxu0 %v553_v52 }
 0x34e   :  { %2356 = vmatprep.subr.mxu0 %v552_v53 }
 0x34f   :  { %2357 = vmatpush3.msra.mxu0 %v552_v53 }
 0x350   :  { %2358 = vmatprep.subr.mxu0 %v551_v54 }
 0x351   :  { %2359 = vmatpush3.msra.mxu0 %v551_v54 }
 0x352   :  { %2360 = vmatprep.subr.mxu0 %v550_v55 }
 0x353   :  { %2361 = vmatpush3.msra.mxu0 %v550_v55 }
 0x354   :  { %2362 = vmatprep.subr.mxu0 %v549_v56 }
 0x355   :  { %2363 = vmatpush3.msra.mxu0 %v549_v56 }
 0x356   :  { %2364 = vmatprep.subr.mxu0 %v548_v57 }
 0x357   :  { %2365 = vmatpush3.msra.mxu0 %v548_v57 }
 0x358   :  { %2404 = vmatprep.subr.mxu0 %v773_v58 }
 0x3f8   :  { %v2298_v21 = vpop.f32.mrf.mxu0 }
 0x3f9   :  { %v409_v23 = vadd.f32 %v2298_v21, %v1887_v19  ;;  %v762_v21 = vld [vmem:[#allocation5 + $0x370] sm:$0xff] }
 0x3fa   :  { %v403_v24 = vpop.f32.mrf.mxu0 }
 0x3fb   :  { %v404_v26 = vadd.f32 %v1887_v19, %v403_v24  ;;  %v509_v27 = vadd.f32 %v505_v22, %v409_v23  ;;  %v764_v19 = vld [vmem:[#allocation5 + $0x380] sm:$0xff]  ;;  %v761_v22 = vld [vmem:[#allocation5 + $0x368] sm:$0xff]  ;;  %v759_v24 = vld [vmem:[#allocation5 + $0x358] sm:$0xff] }
 0x3fc   :  { %v760_v23 = vld [vmem:[#allocation5 + $0x360] sm:$0xff] }
 0x3fd   :  { %514 = vadd.xlane.f32.xlu1 %v509_v27  ;;  %v508_v28 = vadd.f32 %v500_v25, %v404_v26  ;;  %v758_v25 = vld [vmem:[#allocation5 + $0x350] sm:$0xff]  ;;  %v677_v26 = vld [vmem:[#allocation5 + $0x340] sm:$0xff] }
 0x3fe   :  { %2369 = vmatprep.subr.mxu1 %v677_v26 }
 0x3ff   :  { %512 = vadd.xlane.f32.xlu0 %v508_v28  ;;  %2370 = vmatpush3.msra.mxu1 %v677_v26 }
 0x486   :  { %v515_v32 = vpop.xlane.xlu1 %514 }
 0x487   :  { %v517_v33 = vmul.f32 0.03125, %v515_v32  ;;  %v671_v32 = vld [vmem:[#allocation5 + $0x310] sm:$0xff] }
 0x488   :  { %v513_v34 = vpop.xlane.xlu0 %512 }
 0x489   :  { %v519_v35 = vsub.f32 %v509_v27, %v517_v33  ;;  %v516_v36 = vmul.f32 0.03125, %v513_v34  ;;  %v676_v27 = vld [vmem:[#allocation5 + $0x338] sm:$0xff]  ;;  %v670_v33 = vld [vmem:[#allocation5 + $0x308] sm:$0xff]  ;;  %v669_v34 = vld [vmem:[#allocation5 + $0x300] sm:$0xff] }
 0x48a   :  { %2371 = vmatprep.subr.mxu1 %v676_v27 }
 0x48b   :  { %v518_v37 = vsub.f32 %v508_v28, %v516_v36  ;;  %v521_v38 = vmul.f32 %v2903_v49, %v519_v35  ;;  %2372 = vmatpush3.msra.mxu1 %v676_v27  ;;  %v675_v28 = vld [vmem:[#allocation5 + $0x330] sm:$0xff]  ;;  %v668_v35 = vld [vmem:[#allocation5 + $0x2f8] sm:$0xff] }
 0x48c   :  { %2373 = vmatprep.subr.mxu1 %v675_v28  ;;  %v667_v36 = vld [vmem:[#allocation5 + $0x2f0] sm:$0xff] }
 0x48d   :  { %v523_v39 = vmul.f32 %v521_v38, %v521_v38  ;;  %v520_v40 = vmul.f32 %v2903_v49, %v518_v37  ;;  %2374 = vmatpush3.msra.mxu1 %v675_v28  ;;  %v666_v37 = vld [vmem:[#allocation5 + $0x2e8] sm:$0xff] }
 0x48e   :  { %2375 = vmatprep.subr.mxu1 %v674_v29 }
 0x48f   :  { %526 = vadd.xlane.f32.xlu1 %v523_v39  ;;  %v522_v41 = vmul.f32 %v520_v40, %v520_v40  ;;  %2376 = vmatpush3.msra.mxu1 %v674_v29  ;;  %v664_v39 = vld [vmem:[#allocation5 + $0x2d8] sm:$0xff] }
 0x490   :  { %2377 = vmatprep.subr.mxu1 %v673_v30 }
 0x491   :  { %524 = vadd.xlane.f32.xlu0 %v522_v41  ;;  %2378 = vmatpush3.msra.mxu1 %v673_v30  ;;  %v662_v41 = vld [vmem:[#allocation5 + $0x2c8] sm:$0xff] }
 0x492   :  { %2379 = vmatprep.subr.mxu1 %v672_v31 }
 0x493   :  { %2380 = vmatpush3.msra.mxu1 %v672_v31 }
 0x494   :  { %2381 = vmatprep.subr.mxu1 %v671_v32 }
 0x495   :  { %2382 = vmatpush3.msra.mxu1 %v671_v32  ;;  %v906_v32 = vld [vmem:[#allocation5 + $0x448] sm:$0xff] }
 0x496   :  { %2383 = vmatprep.subr.mxu1 %v670_v33 }
 0x497   :  { %2384 = vmatpush3.msra.mxu1 %v670_v33  ;;  %v1002_v33 = vld [vmem:[#allocation5 + $0x4d0] sm:$0xff] }
 0x498   :  { %2385 = vmatprep.subr.mxu1 %v669_v34 }
 0x499   :  { %2386 = vmatpush3.msra.mxu1 %v669_v34  ;;  %v905_v34 = vld [vmem:[#allocation5 + $0x440] sm:$0xff] }
 0x49a   :  { %2387 = vmatprep.subr.mxu1 %v668_v35 }
 0x49b   :  { %2388 = vmatpush3.msra.mxu1 %v668_v35  ;;  %v1001_v35 = vld [vmem:[#allocation5 + $0x4c8] sm:$0xff] }
 0x49c   :  { %2389 = vmatprep.subr.mxu1 %v667_v36 }
 0x49d   :  { %2390 = vmatpush3.msra.mxu1 %v667_v36  ;;  %v904_v36 = vld [vmem:[#allocation5 + $0x438] sm:$0xff] }
 0x49e   :  { %2391 = vmatprep.subr.mxu1 %v666_v37 }
 0x49f   :  { %2392 = vmatpush3.msra.mxu1 %v666_v37  ;;  %v1000_v37 = vld [vmem:[#allocation5 + $0x4c0] sm:$0xff] }
 0x518   :  { %v527_v59 = vpop.xlane.xlu1 %526 }
 0x519   :  { %v529_v60 = vmul.f32 0.03125, %v527_v59 }
 0x51a   :  { %v525_v61 = vpop.xlane.xlu0 %524 }
 0x51b   :  { %v531_v62 = vadd.f32 1e-05, %v529_v60  ;;  %v528_v63 = vmul.f32 0.03125, %v525_v61 }
 0x51d   :  { %2772 = vrsqrt.f32 %v531_v62  ;;  %v530_v0 = vadd.f32 1e-05, %v528_v63 }
 0x51f   :  { %2774 = vrsqrt.f32 %v530_v0 }
 0x52a   :  { %v2773_v1 = vpop.eup %2772 }
 0x52b   :  { %v535_v3 = vmul.f32 %v2773_v1, %v521_v38  ;;  %v665_v38 = vld [vmem:[#allocation5 + $0x2e0] sm:$0xff] }
 0x52c   :  { %v2775_v4 = vpop.eup %2774  ;;  %2393 = vmatprep.subr.mxu1 %v665_v38 }
 0x52d   :  { %v534_v5 = vmul.f32 %v2775_v4, %v520_v40  ;;  %v541_v6 = vmul.f32 %v1889_v2, %v535_v3  ;;  %2394 = vmatpush3.msra.mxu1 %v665_v38  ;;  %v663_v40 = vld [vmem:[#allocation5 + $0x2d0] sm:$0xff] }
 0x52e   :  { %2395 = vmatprep.subr.mxu1 %v664_v39  ;;  %v903_v38 = vld [vmem:[#allocation5 + $0x430] sm:$0xff] }
 0x52f   :  { %v540_v8 = vmul.f32 %v1889_v2, %v534_v5  ;;  %v547_v10 = vadd.f32 %v1890_v7, %v541_v6  ;;  %2396 = vmatpush3.msra.mxu1 %v664_v39  ;;  %v1893_v5 = vld [vmem:[#allocation5 + $0x3d0] ss:$0 sm:$0xff]  ;;  %v1892_v6 = vld [vmem:[#allocation5 + $0x348] ss:$0 sm:$0xff]  ;;  %v999_v39 = vld [vmem:[#allocation5 + $0x4b8] sm:$0xff] }
 0x530   :  { %2397 = vmatprep.subr.mxu1 %v663_v40 }
 0x531   :  { %v546_v9 = vadd.f32 %v1890_v7, %v540_v8  ;;  %2398 = vmatpush3.msra.mxu1 %v663_v40  ;;  %v902_v40 = vld [vmem:[#allocation5 + $0x428] sm:$0xff] }
 0x532   :  { %2399 = vmatprep.subr.mxu1 %v662_v41 }
 0x533   :  { %2366 = vmatprep.mubr.f32.mxu0 %v546_v9  ;;  %2400 = vmatpush3.msra.mxu1 %v662_v41  ;;  %v998_v41 = vld [vmem:[#allocation5 + $0x4b0] sm:$0xff] }
 0x534   :  { %2367 = vmatmul.mubr.f32.vlgmr.msra.gmra.mxu0 %v547_v10 }
 0x535   :  { %2405 = vmatpush3.msra.mxu0 %v773_v58  ;;  %2436 = vmatprep.mubr.f32.mxu0 %v546_v9 }
 0x536   :  { %2406 = vmatprep.subr.mxu0 %v772_v11 }
 0x537   :  { %2407 = vmatpush3.msra.mxu0 %v772_v11 }
 0x538   :  { %2408 = vmatprep.subr.mxu0 %v771_v12 }
 0x539   :  { %2409 = vmatpush3.msra.mxu0 %v771_v12 }
 0x53a   :  { %2410 = vmatprep.subr.mxu0 %v770_v13 }
 0x53b   :  { %2411 = vmatpush3.msra.mxu0 %v770_v13 }
 0x53c   :  { %2412 = vmatprep.subr.mxu0 %v769_v14 }
 0x53d   :  { %2413 = vmatpush3.msra.mxu0 %v769_v14 }
 0x53e   :  { %2414 = vmatprep.subr.mxu0 %v768_v15 }
 0x53f   :  { %2415 = vmatpush3.msra.mxu0 %v768_v15 }
 0x540   :  { %2416 = vmatprep.subr.mxu0 %v767_v16 }
 0x541   :  { %2417 = vmatpush3.msra.mxu0 %v767_v16  ;;  %v909_v16 = vld [vmem:[#allocation5 + $0x460] sm:$0xff] }
 0x542   :  { %2418 = vmatprep.subr.mxu0 %v766_v17  ;;  %2439 = vmatprep.subr.mxu1 %v909_v16 }
 0x543   :  { %2419 = vmatpush3.msra.mxu0 %v766_v17  ;;  %v1005_v17 = vld [vmem:[#allocation5 + $0x4e8] sm:$0xff] }
 0x544   :  { %2420 = vmatprep.subr.mxu0 %v765_v18 }
 0x545   :  { %2421 = vmatpush3.msra.mxu0 %v765_v18  ;;  %v908_v18 = vld [vmem:[#allocation5 + $0x458] sm:$0xff] }
 0x546   :  { %2422 = vmatprep.subr.mxu0 %v764_v19 }
 0x547   :  { %2423 = vmatpush3.msra.mxu0 %v764_v19  ;;  %v1004_v19 = vld [vmem:[#allocation5 + $0x4e0] sm:$0xff] }
 0x548   :  { %2424 = vmatprep.subr.mxu0 %v763_v20 }
 0x549   :  { %2425 = vmatpush3.msra.mxu0 %v763_v20  ;;  %v907_v20 = vld [vmem:[#allocation5 + $0x450] sm:$0xff] }
 0x54a   :  { %2426 = vmatprep.subr.mxu0 %v762_v21 }
 0x54b   :  { %2427 = vmatpush3.msra.mxu0 %v762_v21  ;;  %v1003_v21 = vld [vmem:[#allocation5 + $0x4d8] sm:$0xff] }
 0x54c   :  { %2428 = vmatprep.subr.mxu0 %v761_v22 }
 0x54d   :  { %2429 = vmatpush3.msra.mxu0 %v761_v22 }
 0x54e   :  { %2430 = vmatprep.subr.mxu0 %v760_v23 }
 0x54f   :  { %2431 = vmatpush3.msra.mxu0 %v760_v23 }
 0x550   :  { %2432 = vmatprep.subr.mxu0 %v759_v24 }
 0x551   :  { %2433 = vmatpush3.msra.mxu0 %v759_v24 }
 0x552   :  { %2434 = vmatprep.subr.mxu0 %v758_v25 }
 0x553   :  { %2435 = vmatpush3.msra.mxu0 %v758_v25 }
 0x554   :  { %2437 = vmatmul.mubr.f32.vlgmr.msra.gmra.mxu0 %v547_v10  ;;  %2474 = vmatprep.subr.mxu0 %v1005_v17 }
 0x555   :  { %2475 = vmatpush3.msra.mxu0 %v1005_v17  ;;  %v1099_v17 = vld [vmem:[#allocation5 + $0x560] sm:$0xff] }
 0x556   :  { %2476 = vmatprep.subr.mxu0 %v1004_v19 }
 0x557   :  { %2477 = vmatpush3.msra.mxu0 %v1004_v19  ;;  %v1098_v19 = vld [vmem:[#allocation5 + $0x558] sm:$0xff] }
 0x558   :  { %2478 = vmatprep.subr.mxu0 %v1003_v21 }
 0x559   :  { %2479 = vmatpush3.msra.mxu0 %v1003_v21  ;;  %v1097_v21 = vld [vmem:[#allocation5 + $0x550] sm:$0xff] }
 0x55a   :  { %2480 = vmatprep.subr.mxu0 %v1002_v33 }
 0x55b   :  { %2481 = vmatpush3.msra.mxu0 %v1002_v33  ;;  %v1091_v33 = vld [vmem:[#allocation5 + $0x520] sm:$0xff] }
 0x55c   :  { %2482 = vmatprep.subr.mxu0 %v1001_v35 }
 0x55d   :  { %2483 = vmatpush3.msra.mxu0 %v1001_v35  ;;  %v1090_v35 = vld [vmem:[#allocation5 + $0x518] sm:$0xff] }
 0x55e   :  { %2484 = vmatprep.subr.mxu0 %v1000_v37 }
 0x55f   :  { %2485 = vmatpush3.msra.mxu0 %v1000_v37  ;;  %v1089_v37 = vld [vmem:[#allocation5 + $0x510] sm:$0xff] }
 0x560   :  { %2486 = vmatprep.subr.mxu0 %v999_v39 }
 0x561   :  { %2487 = vmatpush3.msra.mxu0 %v999_v39  ;;  %v1088_v39 = vld [vmem:[#allocation5 + $0x508] sm:$0xff] }
 0x562   :  { %2488 = vmatprep.subr.mxu0 %v998_v41 }
 0x563   :  { %2489 = vmatpush3.msra.mxu0 %v998_v41  ;;  %v1087_v41 = vld [vmem:[#allocation5 + $0x500] sm:$0xff] }
 0x5f4   :  { %v2368_v43 = vpop.f32.mrf.mxu0 }
 0x5f5   :  { %v641_v44 = vadd.f32 %v2368_v43, %v1891_v42  ;;  %v997_v43 = vld [vmem:[#allocation5 + $0x4a8] sm:$0xff] }
 0x5f6   :  { %v635_v46 = vpop.f32.mrf.mxu0  ;;  %2490 = vmatprep.subr.mxu0 %v997_v43 }
 0x5f7   :  { %v647_v47 = vmul.f32 0.044715, %v641_v44  ;;  %v636_v50 = vadd.f32 %v1891_v42, %v635_v46  ;;  %v645_v1 = vmul.f32 0.5, %v641_v44  ;;  %v901_v42 = vld [vmem:[#allocation5 + $0x420] sm:$0xff]  ;;  %2491 = vmatpush3.msra.mxu0 %v997_v43  ;;  %v1197_v43 = vld [vmem:[#allocation5 + $0x5f8] sm:$0xff] }
 0x5f8   :  { %v996_v46 = vld [vmem:[#allocation5 + $0x4a0] sm:$0xff] }
 0x5f9   :  { %v649_v51 = vmul.f32 %v647_v47, %v641_v44  ;;  %v646_v52 = vmul.f32 0.044715, %v636_v50  ;;  %v644_v63 = vmul.f32 0.5, %v636_v50  ;;  %v899_v47 = vld [vmem:[#allocation5 + $0x410] sm:$0xff]  ;;  %2492 = vmatprep.subr.mxu0 %v996_v46 }
 0x5fa   :  { %2493 = vmatpush3.msra.mxu0 %v996_v46  ;;  %v1195_v46 = vld [vmem:[#allocation5 + $0x5e8] sm:$0xff] }
 0x5fb   :  { %v651_v53 = vmul.f32 %v649_v51, %v641_v44  ;;  %v648_v54 = vmul.f32 %v646_v52, %v636_v50  ;;  %v898_v51 = vld [vmem:[#allocation5 + $0x408] sm:$0xff]  ;;  %v994_v52 = vld [vmem:[#allocation5 + $0x490] sm:$0xff] }
 0x5fd   :  { %v653_v55 = vadd.f32 %v651_v53, %v641_v44  ;;  %v650_v56 = vmul.f32 %v648_v54, %v636_v50  ;;  %v900_v44 = vld [vmem:[#allocation5 + $0x418] sm:$0xff]  ;;  %v897_v53 = vld [vmem:[#allocation5 + $0x400] sm:$0xff]  ;;  %v993_v54 = vld [vmem:[#allocation5 + $0x488] sm:$0xff] }
 0x5ff   :  { %v652_v57 = vadd.f32 %v650_v56, %v636_v50  ;;  %v655_v58 = vmul.f32 0.7978846, %v653_v55  ;;  %v995_v50 = vld [vmem:[#allocation5 + $0x498] sm:$0xff]  ;;  %v992_v56 = vld [vmem:[#allocation5 + $0x480] sm:$0xff] }
 0x600   :  { %2494 = vmatprep.subr.mxu0 %v995_v50  ;;  %v896_v55 = vld [vmem:[#allocation5 + $0x3f8] sm:$0xff] }
 0x601   :  { %v654_v59 = vmul.f32 0.7978846, %v652_v57  ;;  %2776 = vtanh.f32 %v655_v58  ;;  %2495 = vmatpush3.msra.mxu0 %v995_v50  ;;  %v895_v57 = vld [vmem:[#allocation5 + $0x3f0] sm:$0xff]  ;;  %v991_v58 = vld [vmem:[#allocation5 + $0x478] sm:$0xff] }
 0x602   :  { %2496 = vmatprep.subr.mxu0 %v994_v52  ;;  %v1193_v50 = vld [vmem:[#allocation5 + $0x5d8] sm:$0xff] }
 0x603   :  { %2778 = vtanh.f32 %v654_v59  ;;  %2497 = vmatpush3.msra.mxu0 %v994_v52  ;;  %v894_v59 = vld [vmem:[#allocation5 + $0x3e8] sm:$0xff] }
 0x604   :  { %2498 = vmatprep.subr.mxu0 %v993_v54  ;;  %v1191_v52 = vld [vmem:[#allocation5 + $0x5c8] sm:$0xff] }
 0x605   :  { %2499 = vmatpush3.msra.mxu0 %v993_v54  ;;  %v1189_v54 = vld [vmem:[#allocation5 + $0x5b8] sm:$0xff] }
 0x606   :  { %2500 = vmatprep.subr.mxu0 %v992_v56 }
 0x607   :  { %2501 = vmatpush3.msra.mxu0 %v992_v56  ;;  %v1187_v56 = vld [vmem:[#allocation5 + $0x5a8] sm:$0xff] }
 0x608   :  { %2502 = vmatprep.subr.mxu0 %v991_v58 }
 0x609   :  { %2503 = vmatpush3.msra.mxu0 %v991_v58  ;;  %v1185_v58 = vld [vmem:[#allocation5 + $0x598] sm:$0xff] }
 0x60e   :  { %v2777_v60 = vpop.eup %2776 }
 0x60f   :  { %v659_v62 = vadd.f32 1.0, %v2777_v60  ;;  %v990_v60 = vld [vmem:[#allocation5 + $0x470] sm:$0xff] }
 0x610   :  { %v2779_v61 = vpop.eup %2778  ;;  %2504 = vmatprep.subr.mxu0 %v990_v60 }
 0x611   :  { %v658_v0 = vadd.f32 1.0, %v2779_v61  ;;  %v661_v3 = vmul.f32 %v659_v62, %v645_v1  ;;  %v1101_v61 = vld [vmem:[#allocation5 + $0x570] sm:$0xff]  ;;  %2505 = vmatpush3.msra.mxu0 %v990_v60  ;;  %v1213_v62 = vld [vmem:[#allocation5 + $0x678] sm:$0xff]  ;;  %v1183_v60 = vld [vmem:[#allocation5 + $0x588] sm:$0xff] }
 0x612   :  { %2544 = vmatprep.subr.mxu0 %v1213_v62 }
 0x613   :  { %v660_v2 = vmul.f32 %v658_v0, %v644_v63 }
 0x614   :  { %v2438_v4 = vpop.f32.mrf.mxu0 }
 0x615   :  { %2401 = vmatprep.mubr.f32.mxu1 %v660_v2  ;;  %v851_v9 = vadd.f32 %v2438_v4, %v1893_v5 }
 0x616   :  { %2402 = vmatmul.mubr.f32.vlgmr.msra.gmra.mxu1 %v661_v3  ;;  %v845_v7 = vpop.f32.mrf.mxu0 }
 0x617   :  { %v846_v12 = vadd.f32 %v1893_v5, %v845_v7  ;;  %2440 = vmatpush3.msra.mxu1 %v909_v16  ;;  %v1212_v16 = vld [vmem:[#allocation5 + $0x670] sm:$0xff] }
 0x618   :  { %2441 = vmatprep.subr.mxu1 %v908_v18 }
 0x619   :  { %2442 = vmatpush3.msra.mxu1 %v908_v18  ;;  %v1211_v18 = vld [vmem:[#allocation5 + $0x668] sm:$0xff] }
 0x61a   :  { %2443 = vmatprep.subr.mxu1 %v907_v20 }
 0x61b   :  { %2444 = vmatpush3.msra.mxu1 %v907_v20  ;;  %v1210_v20 = vld [vmem:[#allocation5 + $0x660] sm:$0xff] }
 0x61c   :  { %2445 = vmatprep.subr.mxu1 %v906_v32 }
 0x61d   :  { %2446 = vmatpush3.msra.mxu1 %v906_v32  ;;  %v1204_v32 = vld [vmem:[#allocation5 + $0x630] sm:$0xff] }
 0x61e   :  { %2447 = vmatprep.subr.mxu1 %v905_v34 }
 0x61f   :  { %2448 = vmatpush3.msra.mxu1 %v905_v34  ;;  %v1203_v34 = vld [vmem:[#allocation5 + $0x628] sm:$0xff] }
 0x620   :  { %2449 = vmatprep.subr.mxu1 %v904_v36 }
 0x621   :  { %2450 = vmatpush3.msra.mxu1 %v904_v36  ;;  %v1202_v36 = vld [vmem:[#allocation5 + $0x620] sm:$0xff] }
 0x622   :  { %2451 = vmatprep.subr.mxu1 %v903_v38 }
 0x623   :  { %2452 = vmatpush3.msra.mxu1 %v903_v38  ;;  %v1201_v38 = vld [vmem:[#allocation5 + $0x618] sm:$0xff] }
 0x624   :  { %2453 = vmatprep.subr.mxu1 %v902_v40 }
 0x625   :  { %2454 = vmatpush3.msra.mxu1 %v902_v40  ;;  %v1200_v40 = vld [vmem:[#allocation5 + $0x610] sm:$0xff] }
 0x626   :  { %2455 = vmatprep.subr.mxu1 %v901_v42 }
 0x627   :  { %2456 = vmatpush3.msra.mxu1 %v901_v42  ;;  %v1086_v42 = vld [vmem:[#allocation5 + $0x4f8] sm:$0xff] }
 0x628   :  { %2457 = vmatprep.subr.mxu1 %v900_v44 }
 0x629   :  { %2458 = vmatpush3.msra.mxu1 %v900_v44  ;;  %v1196_v44 = vld [vmem:[#allocation5 + $0x5f0] sm:$0xff] }
 0x62a   :  { %2459 = vmatprep.subr.mxu1 %v899_v47 }
 0x62b   :  { %2460 = vmatpush3.msra.mxu1 %v899_v47  ;;  %v1194_v47 = vld [vmem:[#allocation5 + $0x5e0] sm:$0xff] }
 0x62c   :  { %2461 = vmatprep.subr.mxu1 %v898_v51 }
 0x62d   :  { %2462 = vmatpush3.msra.mxu1 %v898_v51  ;;  %v1192_v51 = vld [vmem:[#allocation5 + $0x5d0] sm:$0xff] }
 0x62e   :  { %2463 = vmatprep.subr.mxu1 %v897_v53 }
 0x62f   :  { %2464 = vmatpush3.msra.mxu1 %v897_v53  ;;  %v1190_v53 = vld [vmem:[#allocation5 + $0x5c0] sm:$0xff] }
 0x630   :  { %2465 = vmatprep.subr.mxu1 %v896_v55 }
 0x631   :  { %2466 = vmatpush3.msra.mxu1 %v896_v55  ;;  %v1188_v55 = vld [vmem:[#allocation5 + $0x5b0] sm:$0xff] }
 0x632   :  { %2467 = vmatprep.subr.mxu1 %v895_v57 }
 0x633   :  { %2468 = vmatpush3.msra.mxu1 %v895_v57  ;;  %v1186_v57 = vld [vmem:[#allocation5 + $0x5a0] sm:$0xff] }
 0x634   :  { %2469 = vmatprep.subr.mxu1 %v894_v59 }
 0x635   :  { %2470 = vmatpush3.msra.mxu1 %v894_v59  ;;  %v1184_v59 = vld [vmem:[#allocation5 + $0x590] sm:$0xff] }
 0x636   :  { %2509 = vmatprep.subr.mxu1 %v1101_v61 }
 0x6d6   :  { %v2403_v8 = vpop.f32.mrf.mxu1 }
 0x6d7   :  { %v755_v10 = vadd.f32 %v2403_v8, %v1892_v6 }
 0x6d8   :  { %v749_v11 = vpop.f32.mrf.mxu1 }
 0x6d9   :  { %v750_v13 = vadd.f32 %v1892_v6, %v749_v11  ;;  %v855_v14 = vadd.f32 %v851_v9, %v755_v10  ;;  %v1894_v6 = vld [vmem:[#allocation5 + $0x3d8] ss:$0 sm:$0xff]  ;;  %v1895_v11 = vld [vmem:[#allocation5 + $0x3e0] ss:$0 sm:$0xff] }
 0x6db   :  { %860 = vadd.xlane.f32.xlu1 %v855_v14  ;;  %v854_v15 = vadd.f32 %v846_v12, %v750_v13 }
 0x6dd   :  { %858 = vadd.xlane.f32.xlu0 %v854_v15 }
 0x764   :  { %v861_v22 = vpop.xlane.xlu1 %860 }
 0x765   :  { %v863_v23 = vmul.f32 0.03125, %v861_v22  ;;  %v1209_v22 = vld [vmem:[#allocation5 + $0x658] sm:$0xff] }
 0x766   :  { %v859_v24 = vpop.xlane.xlu0 %858 }
 0x767   :  { %v865_v25 = vsub.f32 %v855_v14, %v863_v23  ;;  %v862_v26 = vmul.f32 0.03125, %v859_v24  ;;  %v1096_v23 = vld [vmem:[#allocation5 + $0x548] sm:$0xff]  ;;  %v1208_v24 = vld [vmem:[#allocation5 + $0x650] sm:$0xff] }
 0x769   :  { %v864_v27 = vsub.f32 %v854_v15, %v862_v26  ;;  %v2910_v28 = vmul.f32 %v2903_v49, %v865_v25  ;;  %v1100_v15 = vld [vmem:[#allocation5 + $0x568] sm:$0xff]  ;;  %v1095_v25 = vld [vmem:[#allocation5 + $0x540] sm:$0xff] }
 0x76a   :  { %v1207_v26 = vld [vmem:[#allocation5 + $0x648] sm:$0xff] }
 0x76b   :  { %v869_v29 = vmul.f32 %v2910_v28, %v2910_v28  ;;  %v2915_v30 = vmul.f32 %v2903_v49, %v864_v27  ;;  %v1094_v27 = vld [vmem:[#allocation5 + $0x538] sm:$0xff] }
 0x76d   :  { %872 = vadd.xlane.f32.xlu1 %v869_v29  ;;  %v868_v31 = vmul.f32 %v2915_v30, %v2915_v30  ;;  %v1093_v29 = vld [vmem:[#allocation5 + $0x530] sm:$0xff] }
 0x76f   :  { %870 = vadd.xlane.f32.xlu0 %v868_v31  ;;  %v1092_v31 = vld [vmem:[#allocation5 + $0x528] sm:$0xff] }
 0x7f6   :  { %v873_v63 = vpop.xlane.xlu1 %872 }
 0x7f7   :  { %v875_v0 = vmul.f32 0.03125, %v873_v63  ;;  %v1198_v63 = vld [vmem:[#allocation5 + $0x600] sm:$0xff] }
 0x7f8   :  { %v871_v1 = vpop.xlane.xlu0 %870 }
 0x7f9   :  { %v877_v2 = vadd.f32 1e-05, %v875_v0  ;;  %v874_v3 = vmul.f32 0.03125, %v871_v1  ;;  %v1379_v0 = vld [vmem:[#allocation5 + $0x6f8] sm:$0xff] }
 0x7fa   :  { %v1472_v1 = vld [vmem:[#allocation5 + $0x778] sm:$0xff] }
 0x7fb   :  { %2780 = vrsqrt.f32 %v877_v2  ;;  %v876_v4 = vadd.f32 1e-05, %v874_v3  ;;  %v1471_v2 = vld [vmem:[#allocation5 + $0x770] sm:$0xff]  ;;  %v1470_v3 = vld [vmem:[#allocation5 + $0x768] sm:$0xff] }
 0x7fd   :  { %2782 = vrsqrt.f32 %v876_v4  ;;  %v1469_v4 = vld [vmem:[#allocation5 + $0x760] sm:$0xff] }
 0x808   :  { %v2781_v5 = vpop.eup %2780 }
 0x809   :  { %v881_v7 = vmul.f32 %v2781_v5, %v2910_v28  ;;  %v1206_v28 = vld [vmem:[#allocation5 + $0x640] sm:$0xff]  ;;  %v1468_v5 = vld [vmem:[#allocation5 + $0x758] sm:$0xff] }
 0x80a   :  { %v2783_v8 = vpop.eup %2782 }
 0x80b   :  { %v880_v9 = vmul.f32 %v2783_v8, %v2915_v30  ;;  %v887_v10 = vmul.f32 %v1894_v6, %v881_v7  ;;  %v1205_v30 = vld [vmem:[#allocation5 + $0x638] sm:$0xff]  ;;  %v1466_v7 = vld [vmem:[#allocation5 + $0x748] sm:$0xff]  ;;  %v1465_v8 = vld [vmem:[#allocation5 + $0x740] sm:$0xff] }
 0x80d   :  { %v886_v12 = vmul.f32 %v1894_v6, %v880_v9  ;;  %v2923_v14 = vadd.f32 %v1895_v11, %v887_v10  ;;  %v1467_v6 = vld [vmem:[#allocation5 + $0x750] sm:$0xff]  ;;  %v1464_v9 = vld [vmem:[#allocation5 + $0x738] sm:$0xff] }
 0x80e   :  { %v1463_v10 = vld [vmem:[#allocation5 + $0x730] sm:$0xff] }
 0x80f   :  { %v2921_v13 = vadd.f32 %v1895_v11, %v886_v12  ;;  %v1462_v11 = vld [vmem:[#allocation5 + $0x728] sm:$0xff]  ;;  %v1461_v12 = vld [vmem:[#allocation5 + $0x720] sm:$0xff] }
 0x811   :  { %2471 = vmatprep.mubr.f32.mxu1 %v2921_v13  ;;  %2506 = vmatprep.mubr.f32.mxu0 %v2921_v13 }
 0x812   :  { %2472 = vmatmul.mubr.f32.vlgmr.msra.gmra.mxu1 %v2923_v14  ;;  %2507 = vmatmul.mubr.f32.vlgmr.msra.gmra.mxu0 %v2923_v14 }
 0x813   :  { %2510 = vmatpush3.msra.mxu1 %v1101_v61  ;;  %2541 = vmatprep.mubr.f32.mxu1 %v2921_v13  ;;  %v1182_v61 = vld [vmem:[#allocation5 + $0x580] sm:$0xff] }
 0x814   :  { %2511 = vmatprep.subr.mxu1 %v1100_v15  ;;  %2545 = vmatpush3.msra.mxu0 %v1213_v62  ;;  %v1199_v62 = vld [vmem:[#allocation5 + $0x608] sm:$0xff] }
 0x815   :  { %2512 = vmatpush3.msra.mxu1 %v1100_v15  ;;  %2546 = vmatprep.subr.mxu0 %v1212_v16  ;;  %v1458_v15 = vld [vmem:[#allocation5 + $0x708] sm:$0xff] }
 0x816   :  { %2513 = vmatprep.subr.mxu1 %v1099_v17  ;;  %2547 = vmatpush3.msra.mxu0 %v1212_v16  ;;  %v1457_v16 = vld [vmem:[#allocation5 + $0x700] sm:$0xff] }
 0x817   :  { %2514 = vmatpush3.msra.mxu1 %v1099_v17  ;;  %2548 = vmatprep.subr.mxu0 %v1211_v18 }
 0x818   :  { %2515 = vmatprep.subr.mxu1 %v1098_v19  ;;  %2549 = vmatpush3.msra.mxu0 %v1211_v18 }
 0x819   :  { %2516 = vmatpush3.msra.mxu1 %v1098_v19  ;;  %2550 = vmatprep.subr.mxu0 %v1210_v20  ;;  %v1896_v19 = vld [vmem:[#allocation5 + $0x468] ss:$0 sm:$0xff] }
 0x81a   :  { %2517 = vmatprep.subr.mxu1 %v1097_v21  ;;  %2551 = vmatpush3.msra.mxu0 %v1210_v20 }
 0x81b   :  { %2518 = vmatpush3.msra.mxu1 %v1097_v21  ;;  %2552 = vmatprep.subr.mxu0 %v1209_v22 }
 0x81c   :  { %2519 = vmatprep.subr.mxu1 %v1096_v23  ;;  %2553 = vmatpush3.msra.mxu0 %v1209_v22 }
 0x81d   :  { %2520 = vmatpush3.msra.mxu1 %v1096_v23  ;;  %2554 = vmatprep.subr.mxu0 %v1208_v24 }
 0x81e   :  { %2521 = vmatprep.subr.mxu1 %v1095_v25  ;;  %2555 = vmatpush3.msra.mxu0 %v1208_v24  ;;  %v1897_v24 = vld [vmem:[#allocation5 + $0x4f0] ss:$0 sm:$0xff] }
 0x81f   :  { %2522 = vmatpush3.msra.mxu1 %v1095_v25  ;;  %2556 = vmatprep.subr.mxu0 %v1207_v26 }
 0x820   :  { %2523 = vmatprep.subr.mxu1 %v1094_v27  ;;  %2557 = vmatpush3.msra.mxu0 %v1207_v26  ;;  %v1378_v26 = vld [vmem:[#allocation5 + $0x6f0] sm:$0xff] }
 0x821   :  { %2524 = vmatpush3.msra.mxu1 %v1094_v27  ;;  %2558 = vmatprep.subr.mxu0 %v1206_v28  ;;  %v1377_v27 = vld [vmem:[#allocation5 + $0x6e8] sm:$0xff] }
 0x822   :  { %2525 = vmatprep.subr.mxu1 %v1093_v29  ;;  %2559 = vmatpush3.msra.mxu0 %v1206_v28  ;;  %v1376_v28 = vld [vmem:[#allocation5 + $0x6e0] sm:$0xff] }
 0x823   :  { %2526 = vmatpush3.msra.mxu1 %v1093_v29  ;;  %2560 = vmatprep.subr.mxu0 %v1205_v30  ;;  %v1375_v29 = vld [vmem:[#allocation5 + $0x6d8] sm:$0xff] }
 0x824   :  { %2527 = vmatprep.subr.mxu1 %v1092_v31  ;;  %2561 = vmatpush3.msra.mxu0 %v1205_v30  ;;  %v1374_v30 = vld [vmem:[#allocation5 + $0x6d0] sm:$0xff] }
 0x825   :  { %2528 = vmatpush3.msra.mxu1 %v1092_v31  ;;  %2562 = vmatprep.subr.mxu0 %v1204_v32  ;;  %v1373_v31 = vld [vmem:[#allocation5 + $0x6c8] sm:$0xff] }
 0x826   :  { %2529 = vmatprep.subr.mxu1 %v1091_v33  ;;  %2563 = vmatpush3.msra.mxu0 %v1204_v32  ;;  %v1372_v32 = vld [vmem:[#allocation5 + $0x6c0] sm:$0xff] }
 0x827   :  { %2530 = vmatpush3.msra.mxu1 %v1091_v33  ;;  %2564 = vmatprep.subr.mxu0 %v1203_v34  ;;  %v1371_v33 = vld [vmem:[#allocation5 + $0x6b8] sm:$0xff] }
 0x828   :  { %2531 = vmatprep.subr.mxu1 %v1090_v35  ;;  %2565 = vmatpush3.msra.mxu0 %v1203_v34  ;;  %v1370_v34 = vld [vmem:[#allocation5 + $0x6b0] sm:$0xff] }
 0x829   :  { %2532 = vmatpush3.msra.mxu1 %v1090_v35  ;;  %2566 = vmatprep.subr.mxu0 %v1202_v36  ;;  %v1369_v35 = vld [vmem:[#allocation5 + $0x6a8] sm:$0xff] }
 0x82a   :  { %2533 = vmatprep.subr.mxu1 %v1089_v37  ;;  %2567 = vmatpush3.msra.mxu0 %v1202_v36  ;;  %v1368_v36 = vld [vmem:[#allocation5 + $0x6a0] sm:$0xff] }
 0x82b   :  { %2534 = vmatpush3.msra.mxu1 %v1089_v37  ;;  %2568 = vmatprep.subr.mxu0 %v1201_v38  ;;  %v1367_v37 = vld [vmem:[#allocation5 + $0x698] sm:$0xff] }
 0x82c   :  { %2535 = vmatprep.subr.mxu1 %v1088_v39  ;;  %2569 = vmatpush3.msra.mxu0 %v1201_v38  ;;  %v1366_v38 = vld [vmem:[#allocation5 + $0x690] sm:$0xff] }
 0x82d   :  { %2536 = vmatpush3.msra.mxu1 %v1088_v39  ;;  %2570 = vmatprep.subr.mxu0 %v1200_v40  ;;  %v1365_v39 = vld [vmem:[#allocation5 + $0x688] sm:$0xff] }
 0x82e   :  { %2537 = vmatprep.subr.mxu1 %v1087_v41  ;;  %2571 = vmatpush3.msra.mxu0 %v1200_v40 }
 0x82f   :  { %2538 = vmatpush3.msra.mxu1 %v1087_v41  ;;  %2572 = vmatprep.subr.mxu0 %v1199_v62  ;;  %v1898_v41 = vld [vmem:[#allocation5 + $0x578] ss:$0 sm:$0xff] }
 0x830   :  { %2539 = vmatprep.subr.mxu1 %v1086_v42  ;;  %2573 = vmatpush3.msra.mxu0 %v1199_v62 }
 0x831   :  { %2540 = vmatpush3.msra.mxu1 %v1086_v42  ;;  %2574 = vmatprep.subr.mxu0 %v1198_v63  ;;  %v1364_v42 = vld [vmem:[#allocation5 + $0x680] sm:$0xff] }
 0x832   :  { %2542 = vmatmul.mubr.f32.vlgmr.msra.gmra.mxu1 %v2923_v14  ;;  %2579 = vmatprep.subr.mxu1 %v1197_v43 }
 0x833   :  { %2580 = vmatpush3.msra.mxu1 %v1197_v43  ;;  %2611 = vmatprep.mubr.f32.mxu1 %v2921_v13  ;;  %v1460_v13 = vld [vmem:[#allocation5 + $0x718] sm:$0xff] }
 0x834   :  { %2581 = vmatprep.subr.mxu1 %v1196_v44  ;;  %2575 = vmatpush3.msra.mxu0 %v1198_v63 }
 0x835   :  { %2582 = vmatpush3.msra.mxu1 %v1196_v44  ;;  %2614 = vmatprep.subr.mxu0 %v1379_v0 }
 0x836   :  { %2583 = vmatprep.subr.mxu1 %v1195_v46 }
 0x837   :  { %2584 = vmatpush3.msra.mxu1 %v1195_v46 }
 0x838   :  { %2585 = vmatprep.subr.mxu1 %v1194_v47 }
 0x839   :  { %2586 = vmatpush3.msra.mxu1 %v1194_v47 }
 0x83a   :  { %2587 = vmatprep.subr.mxu1 %v1193_v50 }
 0x83b   :  { %2588 = vmatpush3.msra.mxu1 %v1193_v50 }
 0x83c   :  { %2589 = vmatprep.subr.mxu1 %v1192_v51 }
 0x83d   :  { %2590 = vmatpush3.msra.mxu1 %v1192_v51 }
 0x83e   :  { %2591 = vmatprep.subr.mxu1 %v1191_v52 }
 0x83f   :  { %2592 = vmatpush3.msra.mxu1 %v1191_v52 }
 0x840   :  { %2593 = vmatprep.subr.mxu1 %v1190_v53 }
 0x841   :  { %2594 = vmatpush3.msra.mxu1 %v1190_v53 }
 0x842   :  { %2595 = vmatprep.subr.mxu1 %v1189_v54 }
 0x843   :  { %2596 = vmatpush3.msra.mxu1 %v1189_v54 }
 0x844   :  { %2597 = vmatprep.subr.mxu1 %v1188_v55 }
 0x845   :  { %2598 = vmatpush3.msra.mxu1 %v1188_v55 }
 0x846   :  { %2599 = vmatprep.subr.mxu1 %v1187_v56 }
 0x847   :  { %2600 = vmatpush3.msra.mxu1 %v1187_v56 }
 0x848   :  { %2601 = vmatprep.subr.mxu1 %v1186_v57 }
 0x849   :  { %2602 = vmatpush3.msra.mxu1 %v1186_v57 }
 0x84a   :  { %2603 = vmatprep.subr.mxu1 %v1185_v58 }
 0x84b   :  { %2604 = vmatpush3.msra.mxu1 %v1185_v58 }
 0x84c   :  { %2605 = vmatprep.subr.mxu1 %v1184_v59 }
 0x84d   :  { %2606 = vmatpush3.msra.mxu1 %v1184_v59  ;;  %v1899_v59 = vld [vmem:[#allocation5 + $0x780] ss:$0 sm:$0xff] }
 0x84e   :  { %2607 = vmatprep.subr.mxu1 %v1183_v60 }
 0x84f   :  { %2608 = vmatpush3.msra.mxu1 %v1183_v60 }
 0x850   :  { %2609 = vmatprep.subr.mxu1 %v1182_v61 }
 0x851   :  { %2610 = vmatpush3.msra.mxu1 %v1182_v61 }
 0x852   :  { %2612 = vmatmul.mubr.f32.vlgmr.msra.gmra.mxu1 %v2923_v14  ;;  %2649 = vmatprep.subr.mxu1 %v1472_v1  ;;  %v1459_v14 = vld [vmem:[#allocation5 + $0x710] sm:$0xff] }
 0x853   :  { %2650 = vmatpush3.msra.mxu1 %v1472_v1 }
 0x854   :  { %2651 = vmatprep.subr.mxu1 %v1471_v2 }
 0x855   :  { %2652 = vmatpush3.msra.mxu1 %v1471_v2 }
 0x856   :  { %2653 = vmatprep.subr.mxu1 %v1470_v3 }
 0x857   :  { %2654 = vmatpush3.msra.mxu1 %v1470_v3 }
 0x858   :  { %2655 = vmatprep.subr.mxu1 %v1469_v4 }
 0x859   :  { %2656 = vmatpush3.msra.mxu1 %v1469_v4 }
 0x85a   :  { %2657 = vmatprep.subr.mxu1 %v1468_v5 }
 0x85b   :  { %2658 = vmatpush3.msra.mxu1 %v1468_v5 }
 0x85c   :  { %2659 = vmatprep.subr.mxu1 %v1467_v6 }
 0x85d   :  { %2660 = vmatpush3.msra.mxu1 %v1467_v6 }
 0x85e   :  { %2661 = vmatprep.subr.mxu1 %v1466_v7 }
 0x85f   :  { %2662 = vmatpush3.msra.mxu1 %v1466_v7 }
 0x860   :  { %2663 = vmatprep.subr.mxu1 %v1465_v8 }
 0x861   :  { %2664 = vmatpush3.msra.mxu1 %v1465_v8 }
 0x862   :  { %2665 = vmatprep.subr.mxu1 %v1464_v9 }
 0x863   :  { %2666 = vmatpush3.msra.mxu1 %v1464_v9 }
 0x864   :  { %2667 = vmatprep.subr.mxu1 %v1463_v10 }
 0x865   :  { %2668 = vmatpush3.msra.mxu1 %v1463_v10 }
 0x866   :  { %2669 = vmatprep.subr.mxu1 %v1462_v11 }
 0x867   :  { %2670 = vmatpush3.msra.mxu1 %v1462_v11 }
 0x868   :  { %2671 = vmatprep.subr.mxu1 %v1461_v12 }
 0x869   :  { %2672 = vmatpush3.msra.mxu1 %v1461_v12 }
 0x86a   :  { %2673 = vmatprep.subr.mxu1 %v1460_v13 }
 0x86b   :  { %2674 = vmatpush3.msra.mxu1 %v1460_v13 }
 0x86c   :  { %2675 = vmatprep.subr.mxu1 %v1459_v14 }
 0x86d   :  { %2676 = vmatpush3.msra.mxu1 %v1459_v14 }
 0x86e   :  { %2677 = vmatprep.subr.mxu1 %v1458_v15 }
 0x86f   :  { %2678 = vmatpush3.msra.mxu1 %v1458_v15 }
 0x870   :  { %2679 = vmatprep.subr.mxu1 %v1457_v16 }
 0x871   :  { %2680 = vmatpush3.msra.mxu1 %v1457_v16 }
 0x8d2   :  { %v2473_v17 = vpop.f32.mrf.mxu1  ;;  %v2508_v18 = vpop.f32.mrf.mxu0 }
 0x8d3   :  { %v987_v23 = vadd.f32 %v2473_v17, %v1896_v19  ;;  %v1083_v46 = vadd.f32 %v2508_v18, %v1897_v24 }
 0x8d4   :  { %v981_v20 = vpop.f32.mrf.mxu1  ;;  %v1077_v21 = vpop.f32.mrf.mxu0 }
 0x8d5   :  { %v982_v22 = vadd.f32 %v1896_v19, %v981_v20  ;;  %v1078_v25 = vadd.f32 %v1897_v24, %v1077_v21  ;;  %v1628_v21 = vld [vmem:[#allocation5 + $0x810] sm:$0xff] }
 0x8d7   :  { %2576 = vmatprep.mubr.f32.mxu0 %v982_v22  ;;  %v1627_v22 = vld [vmem:[#allocation5 + $0x808] sm:$0xff] }
 0x8d8   :  { %2577 = vmatmul.mubr.f32.vlgmr.msra.gmra.mxu0 %v987_v23  ;;  %v1626_v23 = vld [vmem:[#allocation5 + $0x800] sm:$0xff] }
 0x8d9   :  { %2615 = vmatpush3.msra.mxu0 %v1379_v0  ;;  %2646 = vmatprep.mubr.f32.mxu0 %v1078_v25 }
 0x8da   :  { %2616 = vmatprep.subr.mxu0 %v1378_v26 }
 0x8db   :  { %2617 = vmatpush3.msra.mxu0 %v1378_v26 }
 0x8dc   :  { %2618 = vmatprep.subr.mxu0 %v1377_v27 }
 0x8dd   :  { %2619 = vmatpush3.msra.mxu0 %v1377_v27 }
 0x8de   :  { %2620 = vmatprep.subr.mxu0 %v1376_v28 }
 0x8df   :  { %2621 = vmatpush3.msra.mxu0 %v1376_v28 }
 0x8e0   :  { %2622 = vmatprep.subr.mxu0 %v1375_v29 }
 0x8e1   :  { %2623 = vmatpush3.msra.mxu0 %v1375_v29 }
 0x8e2   :  { %2624 = vmatprep.subr.mxu0 %v1374_v30 }
 0x8e3   :  { %2625 = vmatpush3.msra.mxu0 %v1374_v30 }
 0x8e4   :  { %2626 = vmatprep.subr.mxu0 %v1373_v31 }
 0x8e5   :  { %2627 = vmatpush3.msra.mxu0 %v1373_v31 }
 0x8e6   :  { %2628 = vmatprep.subr.mxu0 %v1372_v32 }
 0x8e7   :  { %2629 = vmatpush3.msra.mxu0 %v1372_v32 }
 0x8e8   :  { %2630 = vmatprep.subr.mxu0 %v1371_v33 }
 0x8e9   :  { %2631 = vmatpush3.msra.mxu0 %v1371_v33 }
 0x8ea   :  { %2632 = vmatprep.subr.mxu0 %v1370_v34 }
 0x8eb   :  { %2633 = vmatpush3.msra.mxu0 %v1370_v34  ;;  %v1625_v34 = vld [vmem:[#allocation5 + $0x7f8] sm:$0xff] }
 0x8ec   :  { %2634 = vmatprep.subr.mxu0 %v1369_v35 }
 0x8ed   :  { %2635 = vmatpush3.msra.mxu0 %v1369_v35  ;;  %v1624_v35 = vld [vmem:[#allocation5 + $0x7f0] sm:$0xff] }
 0x8ee   :  { %2636 = vmatprep.subr.mxu0 %v1368_v36 }
 0x8ef   :  { %2637 = vmatpush3.msra.mxu0 %v1368_v36  ;;  %v1623_v36 = vld [vmem:[#allocation5 + $0x7e8] sm:$0xff] }
 0x8f0   :  { %2638 = vmatprep.subr.mxu0 %v1367_v37 }
 0x8f1   :  { %2639 = vmatpush3.msra.mxu0 %v1367_v37  ;;  %v1622_v37 = vld [vmem:[#allocation5 + $0x7e0] sm:$0xff] }
 0x8f2   :  { %v2543_v40 = vpop.f32.mrf.mxu1  ;;  %2640 = vmatprep.subr.mxu0 %v1366_v38 }
 0x8f3   :  { %2641 = vmatpush3.msra.mxu0 %v1366_v38  ;;  %v1179_v47 = vadd.f32 %v2543_v40, %v1898_v41  ;;  %v1621_v38 = vld [vmem:[#allocation5 + $0x7d8] sm:$0xff]  ;;  %v1618_v40 = vld [vmem:[#allocation5 + $0x7c0] sm:$0xff] }
 0x8f4   :  { %v1173_v43 = vpop.f32.mrf.mxu1  ;;  %2642 = vmatprep.subr.mxu0 %v1365_v39 }
 0x8f5   :  { %v1174_v44 = vadd.f32 %v1898_v41, %v1173_v43  ;;  %2643 = vmatpush3.msra.mxu0 %v1365_v39  ;;  %v1620_v39 = vld [vmem:[#allocation5 + $0x7d0] sm:$0xff]  ;;  %v1617_v41 = vld [vmem:[#allocation5 + $0x7b8] sm:$0xff]  ;;  %v1615_v43 = vld [vmem:[#allocation5 + $0x7a8] sm:$0xff] }
 0x8f6   :  { %2644 = vmatprep.subr.mxu0 %v1364_v42 }
 0x8f7   :  { %2645 = vmatpush3.msra.mxu0 %v1364_v42  ;;  %2681 = vmatprep.mubr.f32.mxu1 %v1174_v44  ;;  %v1616_v42 = vld [vmem:[#allocation5 + $0x7b0] sm:$0xff]  ;;  %v1614_v44 = vld [vmem:[#allocation5 + $0x7a0] sm:$0xff] }
 0x8f8   :  { %2647 = vmatmul.mubr.f32.vlgmr.msra.gmra.mxu0 %v1083_v46  ;;  %2682 = vmatmul.mubr.f32.vlgmr.msra.gmra.mxu1 %v1179_v47  ;;  %v1613_v46 = vld [vmem:[#allocation5 + $0x798] sm:$0xff] }
 0x8f9   :  { %2684 = vmatprep.subr.mxu0 %v1628_v21 }
 0x8fa   :  { %2685 = vmatpush3.msra.mxu0 %v1628_v21 }
 0x8fb   :  { %2686 = vmatprep.subr.mxu0 %v1627_v22 }
 0x8fc   :  { %2687 = vmatpush3.msra.mxu0 %v1627_v22 }
 0x8fd   :  { %2688 = vmatprep.subr.mxu0 %v1626_v23 }
 0x8fe   :  { %2689 = vmatpush3.msra.mxu0 %v1626_v23 }
 0x8ff   :  { %2690 = vmatprep.subr.mxu0 %v1625_v34 }
 0x900   :  { %2691 = vmatpush3.msra.mxu0 %v1625_v34 }
 0x901   :  { %2692 = vmatprep.subr.mxu0 %v1624_v35 }
 0x902   :  { %2693 = vmatpush3.msra.mxu0 %v1624_v35 }
 0x903   :  { %2694 = vmatprep.subr.mxu0 %v1623_v36 }
 0x904   :  { %2695 = vmatpush3.msra.mxu0 %v1623_v36 }
 0x905   :  { %2696 = vmatprep.subr.mxu0 %v1622_v37 }
 0x906   :  { %2697 = vmatpush3.msra.mxu0 %v1622_v37 }
 0x907   :  { %2698 = vmatprep.subr.mxu0 %v1621_v38 }
 0x908   :  { %2699 = vmatpush3.msra.mxu0 %v1621_v38  ;;  %v1777_v38 = vld [vmem:[#allocation5 + $0x890] sm:$0xff] }
 0x909   :  { %2700 = vmatprep.subr.mxu0 %v1620_v39 }
 0x90a   :  { %2701 = vmatpush3.msra.mxu0 %v1620_v39  ;;  %v1776_v39 = vld [vmem:[#allocation5 + $0x888] sm:$0xff] }
 0x912   :  { %v2613_v50 = vpop.f32.mrf.mxu1 }
 0x914   :  { %v1355_v52 = vpop.f32.mrf.mxu1 }
 0x998   :  { %v2578_v51 = vpop.f32.mrf.mxu0 }
 0x999   :  { %v1361_v54 = vadd.f32 %v2613_v50, %v2578_v51 }
 0x99a   :  { %v1280_v53 = vpop.f32.mrf.mxu0 }
 0x99b   :  { %v1356_v57 = vadd.f32 %v1355_v52, %v1280_v53 }
 0x9b8   :  { %v2648_v55 = vpop.f32.mrf.mxu0  ;;  %v2683_v56 = vpop.f32.mrf.mxu1 }
 0x9b9   :  { %v1456_v58 = vadd.f32 %v2648_v55, %v1361_v54 }
 0x9ba   :  { %v1446_v60 = vpop.f32.mrf.mxu0  ;;  %v1539_v63 = vpop.f32.mrf.mxu1 }
 0x9bb   :  { %v1549_v61 = vadd.f32 %v2683_v56, %v1456_v58  ;;  %v1455_v62 = vadd.f32 %v1446_v60, %v1356_v57  ;;  %v1900_v56 = vld [vmem:[#allocation5 + $0x788] ss:$0 sm:$0xff] }
 0x9bd   :  { %v1556_v0 = vadd.f32 %v1899_v59, %v1549_v61  ;;  %v1548_v1 = vadd.f32 %v1539_v63, %v1455_v62  ;;  %v1901_v61 = vld [vmem:[#allocation5 + $0x790] ss:$0 sm:$0xff] }
 0x9bf   :  { %v1555_v2 = vadd.f32 %v1899_v59, %v1548_v1  ;;  %v1560_v3 = vmul.f32 0.044715, %v1556_v0  ;;  %v1558_v14 = vmul.f32 0.5, %v1556_v0  ;;  %v1902_v1 = vld [vmem:[#allocation5 + $0x818] ss:$0 sm:$0xff] }
 0x9c1   :  { %v1562_v4 = vmul.f32 %v1560_v3, %v1556_v0  ;;  %v1559_v5 = vmul.f32 0.044715, %v1555_v2  ;;  %v1557_v18 = vmul.f32 0.5, %v1555_v2 }
 0x9c3   :  { %v1564_v6 = vmul.f32 %v1562_v4, %v1556_v0  ;;  %v1561_v7 = vmul.f32 %v1559_v5, %v1555_v2 }
 0x9c5   :  { %v1566_v8 = vadd.f32 %v1564_v6, %v1556_v0  ;;  %v1563_v9 = vmul.f32 %v1561_v7, %v1555_v2 }
 0x9c7   :  { %v1568_v10 = vmul.f32 0.7978846, %v1566_v8  ;;  %v1565_v11 = vadd.f32 %v1563_v9, %v1555_v2 }
 0x9c9   :  { %2784 = vtanh.f32 %v1568_v10  ;;  %v1567_v12 = vmul.f32 0.7978846, %v1565_v11 }
 0x9cb   :  { %2786 = vtanh.f32 %v1567_v12 }
 0x9d6   :  { %v2785_v13 = vpop.eup %2784 }
 0x9d7   :  { %v1572_v15 = vadd.f32 1.0, %v2785_v13 }
 0x9d8   :  { %v2787_v16 = vpop.eup %2786 }
 0x9d9   :  { %v1574_v17 = vmul.f32 %v1572_v15, %v1558_v14  ;;  %v1571_v19 = vadd.f32 1.0, %v2787_v16 }
 0x9db   :  { %1579 = vadd.xlane.f32.xlu1 %v1574_v17  ;;  %v1573_v20 = vmul.f32 %v1571_v19, %v1557_v18 }
 0x9dd   :  { %1577 = vadd.xlane.f32.xlu0 %v1573_v20 }
 0xa64   :  { %v1580_v24 = vpop.xlane.xlu1 %1579 }
 0xa65   :  { %v1582_v25 = vmul.f32 0.03125, %v1580_v24  ;;  %v1780_v24 = vld [vmem:[#allocation5 + $0x8a8] sm:$0xff] }
 0xa66   :  { %v1578_v26 = vpop.xlane.xlu0 %1577  ;;  %2719 = vmatprep.subr.mxu1 %v1780_v24 }
 0xa67   :  { %v1584_v27 = vsub.f32 %v1574_v17, %v1582_v25  ;;  %v1581_v28 = vmul.f32 0.03125, %v1578_v26  ;;  %v1779_v25 = vld [vmem:[#allocation5 + $0x8a0] sm:$0xff]  ;;  %2720 = vmatpush3.msra.mxu1 %v1780_v24  ;;  %v1778_v26 = vld [vmem:[#allocation5 + $0x898] sm:$0xff] }
 0xa68   :  { %2721 = vmatprep.subr.mxu1 %v1779_v25 }
 0xa69   :  { %v1583_v29 = vsub.f32 %v1573_v20, %v1581_v28  ;;  %v1586_v30 = vmul.f32 %v2903_v49, %v1584_v27  ;;  %2722 = vmatpush3.msra.mxu1 %v1779_v25 }
 0xa6a   :  { %2723 = vmatprep.subr.mxu1 %v1778_v26 }
 0xa6b   :  { %v1588_v31 = vmul.f32 %v1586_v30, %v1586_v30  ;;  %v1585_v32 = vmul.f32 %v2903_v49, %v1583_v29  ;;  %v1619_v49 = vld [vmem:[#allocation5 + $0x7c8] sm:$0xff]  ;;  %2724 = vmatpush3.msra.mxu1 %v1778_v26 }
 0xa6c   :  { %2702 = vmatprep.subr.mxu0 %v1619_v49  ;;  %2725 = vmatprep.subr.mxu1 %v1777_v38 }
 0xa6d   :  { %1591 = vadd.xlane.f32.xlu1 %v1588_v31  ;;  %v1587_v33 = vmul.f32 %v1585_v32, %v1585_v32  ;;  %2703 = vmatpush3.msra.mxu0 %v1619_v49  ;;  %v1774_v49 = vld [vmem:[#allocation5 + $0x878] sm:$0xff] }
 0xa6e   :  { %2704 = vmatprep.subr.mxu0 %v1618_v40  ;;  %2726 = vmatpush3.msra.mxu1 %v1777_v38 }
 0xa6f   :  { %1589 = vadd.xlane.f32.xlu0 %v1587_v33  ;;  %2705 = vmatpush3.msra.mxu0 %v1618_v40  ;;  %v1772_v40 = vld [vmem:[#allocation5 + $0x868] sm:$0xff] }
 0xa70   :  { %2706 = vmatprep.subr.mxu0 %v1617_v41  ;;  %2727 = vmatprep.subr.mxu1 %v1776_v39 }
 0xa71   :  { %2707 = vmatpush3.msra.mxu0 %v1617_v41  ;;  %2728 = vmatpush3.msra.mxu1 %v1776_v39  ;;  %v1771_v41 = vld [vmem:[#allocation5 + $0x860] sm:$0xff] }
 0xa72   :  { %2708 = vmatprep.subr.mxu0 %v1616_v42  ;;  %2729 = vmatprep.subr.mxu1 %v1775_v45 }
 0xa73   :  { %2709 = vmatpush3.msra.mxu0 %v1616_v42  ;;  %2730 = vmatpush3.msra.mxu1 %v1775_v45  ;;  %v1770_v42 = vld [vmem:[#allocation5 + $0x858] sm:$0xff] }
 0xa74   :  { %2710 = vmatprep.subr.mxu0 %v1615_v43  ;;  %2731 = vmatprep.subr.mxu1 %v1774_v49 }
 0xa75   :  { %2711 = vmatpush3.msra.mxu0 %v1615_v43  ;;  %2732 = vmatpush3.msra.mxu1 %v1774_v49  ;;  %v1769_v43 = vld [vmem:[#allocation5 + $0x850] sm:$0xff] }
 0xa76   :  { %2712 = vmatprep.subr.mxu0 %v1614_v44 }
 0xa77   :  { %2713 = vmatpush3.msra.mxu0 %v1614_v44  ;;  %v1768_v44 = vld [vmem:[#allocation5 + $0x848] sm:$0xff] }
 0xa78   :  { %2714 = vmatprep.subr.mxu0 %v1613_v46 }
 0xa79   :  { %2715 = vmatpush3.msra.mxu0 %v1613_v46  ;;  %v1767_v46 = vld [vmem:[#allocation5 + $0x840] sm:$0xff] }
 0xaf6   :  { %v1592_v47 = vpop.xlane.xlu1 %1591 }
 0xaf7   :  { %v1594_v50 = vmul.f32 0.03125, %v1592_v47  ;;  %v1766_v47 = vld [vmem:[#allocation5 + $0x838] sm:$0xff] }
 0xaf8   :  { %v1590_v51 = vpop.xlane.xlu0 %1589 }
 0xaf9   :  { %v1596_v52 = vadd.f32 1e-05, %v1594_v50  ;;  %v1593_v53 = vmul.f32 0.03125, %v1590_v51  ;;  %v1765_v50 = vld [vmem:[#allocation5 + $0x830] sm:$0xff] }
 0xafb   :  { %2788 = vrsqrt.f32 %v1596_v52  ;;  %v1595_v54 = vadd.f32 1e-05, %v1593_v53 }
 0xafd   :  { %2790 = vrsqrt.f32 %v1595_v54 }
 0xb08   :  { %v2789_v55 = vpop.eup %2788 }
 0xb09   :  { %v1600_v57 = vmul.f32 %v2789_v55, %v1586_v30  ;;  %v1882_v30 = vsel %vm45_vm1, 1.0, %v2870_v48  ;;  %v1773_v48 = vld [vmem:[#allocation5 + $0x870] sm:$0xff] }
 0xb0a   :  { %v2791_v58 = vpop.eup %2790  ;;  %2733 = vmatprep.subr.mxu1 %v1773_v48 }
 0xb0b   :  { %v1599_v59 = vmul.f32 %v2791_v58, %v1585_v32  ;;  %v1606_v60 = vmul.f32 %v1900_v56, %v1600_v57  ;;  %2734 = vmatpush3.msra.mxu1 %v1773_v48  ;;  %v1903_v58 = vld [vmem:[#allocation5 + $0x820] ss:$0 sm:$0xff] }
 0xb0c   :  { %2735 = vmatprep.subr.mxu1 %v1772_v40 }
 0xb0d   :  { %v1605_v62 = vmul.f32 %v1900_v56, %v1599_v59  ;;  %v1612_v0 = vadd.f32 %v1901_v61, %v1606_v60  ;;  %2736 = vmatpush3.msra.mxu1 %v1772_v40 }
 0xb0e   :  { %2737 = vmatprep.subr.mxu1 %v1771_v41 }
 0xb0f   :  { %v1611_v63 = vadd.f32 %v1901_v61, %v1605_v62  ;;  %2738 = vmatpush3.msra.mxu1 %v1771_v41 }
 0xb10   :  { %2739 = vmatprep.subr.mxu1 %v1770_v42 }
 0xb11   :  { %2716 = vmatprep.mubr.f32.mxu0 %v1611_v63  ;;  %2740 = vmatpush3.msra.mxu1 %v1770_v42  ;;  %v1904_v63 = vld [vmem:[#allocation5 + $0x828] ss:$0 sm:$0xff] }
 0xb12   :  { %2717 = vmatmul.mubr.f32.vlgmr.msra.gmra.mxu0 %v1612_v0  ;;  %2741 = vmatprep.subr.mxu1 %v1769_v43 }
 0xb13   :  { %2742 = vmatpush3.msra.mxu1 %v1769_v43 }
 0xb14   :  { %2743 = vmatprep.subr.mxu1 %v1768_v44 }
 0xb15   :  { %2744 = vmatpush3.msra.mxu1 %v1768_v44 }
 0xb16   :  { %2745 = vmatprep.subr.mxu1 %v1767_v46 }
 0xb17   :  { %2746 = vmatpush3.msra.mxu1 %v1767_v46 }
 0xb18   :  { %2747 = vmatprep.subr.mxu1 %v1766_v47 }
 0xb19   :  { %2748 = vmatpush3.msra.mxu1 %v1766_v47 }
 0xb1a   :  { %2749 = vmatprep.subr.mxu1 %v1765_v50 }
 0xb1b   :  { %2750 = vmatpush3.msra.mxu1 %v1765_v50 }
 0xbd2   :  { %v2718_v2 = vpop.f32.mrf.mxu0 }
 0xbd3   :  { %v1706_v3 = vadd.f32 %v2718_v2, %v1902_v1 }
 0xbd4   :  { %v1700_v4 = vpop.f32.mrf.mxu0 }
 0xbd5   :  { %v1712_v5 = vmul.f32 0.044715, %v1706_v3  ;;  %v1701_v6 = vadd.f32 %v1902_v1, %v1700_v4  ;;  %v1710_v17 = vmul.f32 0.5, %v1706_v3 }
 0xbd7   :  { %v1711_v7 = vmul.f32 0.044715, %v1701_v6  ;;  %v1714_v8 = vmul.f32 %v1712_v5, %v1706_v3  ;;  %v1709_v21 = vmul.f32 0.5, %v1701_v6 }
 0xbd9   :  { %v1716_v9 = vmul.f32 %v1714_v8, %v1706_v3  ;;  %v1713_v10 = vmul.f32 %v1711_v7, %v1701_v6 }
 0xbdb   :  { %v1718_v11 = vadd.f32 %v1716_v9, %v1706_v3  ;;  %v1715_v12 = vmul.f32 %v1713_v10, %v1701_v6  ;;  %v1905_v3 = vld [vmem:[#allocation5 + $0x8b0] ss:$0 sm:$0xff] }
 0xbdd   :  { %v1720_v13 = vmul.f32 0.7978846, %v1718_v11  ;;  %v1717_v14 = vadd.f32 %v1715_v12, %v1701_v6 }
 0xbdf   :  { %2792 = vtanh.f32 %v1720_v13  ;;  %v1719_v15 = vmul.f32 0.7978846, %v1717_v14 }
 0xbe1   :  { %2794 = vtanh.f32 %v1719_v15 }
 0xbec   :  { %v2793_v16 = vpop.eup %2792 }
 0xbed   :  { %v1724_v18 = vadd.f32 1.0, %v2793_v16 }
 0xbee   :  { %v2795_v19 = vpop.eup %2794 }
 0xbef   :  { %v1726_v20 = vmul.f32 %v1724_v18, %v1710_v17  ;;  %v1723_v22 = vadd.f32 1.0, %v2795_v19 }
 0xbf1   :  { %1731 = vadd.xlane.f32.xlu1 %v1726_v20  ;;  %v1725_v23 = vmul.f32 %v1723_v22, %v1709_v21 }
 0xbf3   :  { %1729 = vadd.xlane.f32.xlu0 %v1725_v23 }
 0xc7a   :  { %v1732_v27 = vpop.xlane.xlu1 %1731 }
 0xc7b   :  { %v1734_v28 = vmul.f32 0.0625, %v1732_v27 }
 0xc7c   :  { %v1730_v29 = vpop.xlane.xlu0 %1729 }
 0xc7d   :  { %v1736_v31 = vsub.f32 %v1726_v20, %v1734_v28  ;;  %v1733_v32 = vmul.f32 0.0625, %v1730_v29 }
 0xc7f   :  { %v1735_v33 = vsub.f32 %v1725_v23, %v1733_v32  ;;  %v1738_v34 = vmul.f32 %v1882_v30, %v1736_v31 }
 0xc81   :  { %v1740_v35 = vmul.f32 %v1738_v34, %v1738_v34  ;;  %v1737_v36 = vmul.f32 %v1882_v30, %v1735_v33 }
 0xc83   :  { %1743 = vadd.xlane.f32.xlu1 %v1740_v35  ;;  %v1739_v37 = vmul.f32 %v1737_v36, %v1737_v36 }
 0xc85   :  { %1741 = vadd.xlane.f32.xlu0 %v1739_v37 }
 0xd0c   :  { %v1744_v51 = vpop.xlane.xlu1 %1743 }
 0xd0d   :  { %v1746_v52 = vmul.f32 0.0625, %v1744_v51 }
 0xd0e   :  { %v1742_v53 = vpop.xlane.xlu0 %1741 }
 0xd0f   :  { %v1748_v54 = vadd.f32 1e-05, %v1746_v52  ;;  %v1745_v55 = vmul.f32 0.0625, %v1742_v53 }
 0xd11   :  { %2796 = vrsqrt.f32 %v1748_v54  ;;  %v1747_v56 = vadd.f32 1e-05, %v1745_v55 }
 0xd13   :  { %2798 = vrsqrt.f32 %v1747_v56 }
 0xd1e   :  { %v2797_v57 = vpop.eup %2796 }
 0xd1f   :  { %v1752_v59 = vmul.f32 %v2797_v57, %v1738_v34 }
 0xd20   :  { %v2799_v60 = vpop.eup %2798 }
 0xd21   :  { %v1751_v61 = vmul.f32 %v2799_v60, %v1737_v36  ;;  %v1758_v62 = vmul.f32 %v1903_v58, %v1752_v59 }
 0xd23   :  { %v1757_v0 = vmul.f32 %v1903_v58, %v1751_v61  ;;  %v1764_v2 = vadd.f32 %v1904_v63, %v1758_v62 }
 0xd25   :  { %v1763_v1 = vadd.f32 %v1904_v63, %v1757_v0 }
 0xd27   :  { %2751 = vmatprep.mubr.f32.mxu1 %v1763_v1 }
 0xd28   :  { %2752 = vmatmul.mubr.f32.vlgmr.msra.gmra.mxu1 %v1764_v2 }
 0xde8   :  { %v2753_v4 = vpop.f32.mrf.mxu1 }
 0xde9   :  { %v1858_v5 = vadd.f32 %v2753_v4, %v1905_v3 }
 0xdea   :  { %v1852_v6 = vpop.f32.mrf.mxu1 }
 0xdeb   :  { %1862 = vst [vmem:[#allocation7 + $0x8] sm:$0xff] %v1858_v5  ;;  %v1853_v7 = vadd.f32 %v1905_v3, %v1852_v6 }
 0xded   :  { %1861 = vst [vmem:[#allocation7] sm:$0xff] %v1853_v7 }
 0xdee   :  { %2851 = shalt.err (!%p2848_p0)
}
 0xdef   :  { %1874 = dma.vmem_to_hbm [thread:$0]  %s1869_s1, 256, %s2945_s2, [#allocation4], %s2867_s12, %s2867_s12, %s2868_s13  }
 0xdf0   :  { %2864 = dma.done.wait [#allocation4], 256  }
 0xdf1   :  { %2865 = vsyncadd [#allocation4], 4294967040 }
 0xdf2   :  { %1878 = vsyncpa [#allocation3], 1 }
 0xdf3   :  { %1879 = vsyncpa [#allocation6], 1 }
 0xdf4   :  { %1880 = vsyncpa [#allocation4], 1 }

</bundles_post_ra>
